<compile_context>
chip_gen: v6e
topology: v6e:2x2x1
jax: 0.10.0
libtpu: 0.0.40
codegen_flags: <defaults>
</compile_context>

<pallas_src>
import math

import jax
import jax.numpy as jnp
from jax.experimental import pallas as pl
from jax.experimental.pallas import tpu as pltpu

# ---------------- model hyper-parameters (small, consistent with the module) ---
BATCH = 2
SEQ = 8
HIDDEN = 32
HEAD_NUM = 4
HEAD_DIM = HIDDEN // HEAD_NUM
FF_DIM = 128
EPS = 1e-6
SCALE = math.sqrt(HEAD_DIM)


def _layer_norm(y, gamma, beta):
    mu = jnp.mean(y, axis=-1, keepdims=True)
    var = jnp.mean(jnp.square(y - mu), axis=-1, keepdims=True)
    return (y - mu) * jax.lax.rsqrt(var + EPS) * gamma + beta


def encoder_kernel(x_ref, mask_ref, wqkv_ref, bqkv_ref, wo_ref,
                   w1_ref, b1_ref, w2_ref, vecs_ref, o_ref):
    B, S, H = x_ref.shape
    HN = HEAD_NUM
    BH = B * HN

    x3 = x_ref[...].astype(jnp.float32)            # (B, S, H)
    x2 = x3.reshape(B * S, H)                      # leading-dim merge only

    # ---- fused, head-batched QKV projection (1/sqrt(hd) folded into W_Q) ------
    x_bh = jnp.broadcast_to(x3[:, None], (B, HN, S, H)).reshape(BH, S, H)
    w_qkv = wqkv_ref[...]                          # (3*BH, H, HD)
    b_qkv = bqkv_ref[...]                          # (3*BH, 1, HD)
    q = jnp.einsum('bsh,bhd->bsd', x_bh, w_qkv[0:BH],
                   preferred_element_type=jnp.float32) + b_qkv[0:BH]
    k = jnp.einsum('bsh,bhd->bsd', x_bh, w_qkv[BH:2 * BH],
                   preferred_element_type=jnp.float32) + b_qkv[BH:2 * BH]
    v = jnp.einsum('bsh,bhd->bsd', x_bh, w_qkv[2 * BH:3 * BH],
                   preferred_element_type=jnp.float32) + b_qkv[2 * BH:3 * BH]

    # ---- additive mask bias: one compare/select, broadcast over heads ---------
    mbias = jnp.where(mask_ref[...] == 0, -1e9, 0.0).astype(jnp.float32)   # (B,S,S)
    mbias = jnp.broadcast_to(mbias[:, None], (B, HN, S, S)).reshape(BH, S, S)

    # ---- attention: single masked softmax pass for all (batch, head) ----------
    scores = jnp.einsum('bqd,bkd->bqk', q, k,
                        preferred_element_type=jnp.float32) + mbias        # (BH,S,S)
    m = jnp.max(scores, axis=-1, keepdims=True)
    p = jnp.exp(scores - m)
    attn = p * pl.reciprocal(jnp.sum(p, axis=-1, keepdims=True), approx=True)
    # attention dropout is identity in eval mode
    ctx = jnp.einsum('bqk,bkd->bqd', attn, v,
                     preferred_element_type=jnp.float32)                   # (BH,S,HD)

    # ---- output projection: per-head matmul summed over heads (== concat @ Wo)
    oh = jnp.einsum('bqd,bdh->bqh', ctx, wo_ref[...],
                    preferred_element_type=jnp.float32)                    # (BH,S,H)
    oh4 = oh.reshape(B, HN, S, H)
    attn_seq = oh4[:, 0]
    for h in range(1, HN):                                                 # static unroll
        attn_seq = attn_seq + oh4[:, h]                                    # (B,S,H)

    vecs = vecs_ref[...]                      # (6,H): bo, g1, be1, b2, g2, be2
    attn_seq = attn_seq.reshape(B * S, H) + vecs[0:1]

    # ---- input sublayer: x + LayerNorm(attention) ------------------------------
    connected = x2 + _layer_norm(attn_seq, vecs[1:2], vecs[2:3])

    # ---- PositionwiseFeedForward (exact GELU, as nn.GELU default) --------------
    h1 = (jnp.dot(connected, w1_ref[...], preferred_element_type=jnp.float32)
          + b1_ref[...])
    h1 = 0.5 * h1 * (1.0 + jax.lax.erf(h1 * (1.0 / math.sqrt(2.0))))
    ff = jnp.dot(h1, w2_ref[...], preferred_element_type=jnp.float32) + vecs[3:4]

    # ---- output sublayer: connected + LayerNorm(ff); final dropout = identity --
    out = connected + _layer_norm(ff, vecs[4:5], vecs[5:6])
    o_ref[...] = out.reshape(B, S, H).astype(o_ref.dtype)


def _pack_params(params, batch):
    """Head-split, scale-fold, batch-broadcast and fuse the 16 module params into
    6 kernel arrays (fewer refs, no lane slicing inside the kernel)."""
    (wq, bq, wk, bk, wv, bv, wo, bo, g1, be1, w1, b1, w2, b2, g2, be2) = params
    HN, HD, H = HEAD_NUM, HEAD_DIM, HIDDEN

    def w_heads(w):   # (H, H) -> (HN, H, HD)
        return w.reshape(H, HN, HD).transpose(1, 0, 2)

    def b_heads(b):   # (1, H) -> (HN, 1, HD)
        return b.reshape(HN, HD)[:, None, :]

    inv_scale = jnp.float32(1.0 / SCALE)
    w_stack = jnp.stack([w_heads(wq) * inv_scale, w_heads(wk), w_heads(wv)], 0)
    b_stack = jnp.stack([b_heads(bq) * inv_scale, b_heads(bk), b_heads(bv)], 0)
    w_qkv = jnp.broadcast_to(w_stack[:, None], (3, batch, HN, H, HD)
                             ).reshape(3 * batch * HN, H, HD)
    b_qkv = jnp.broadcast_to(b_stack[:, None], (3, batch, HN, 1, HD)
                             ).reshape(3 * batch * HN, 1, HD)

    wo_h = wo.reshape(HN, HD, H)                                   # (HN, HD, H)
    wo_bh = jnp.broadcast_to(wo_h[None], (batch, HN, HD, H)).reshape(batch * HN, HD, H)

    vecs = jnp.concatenate([bo, g1, be1, b2, g2, be2], axis=0)     # (6, H)
    return w_qkv, b_qkv, wo_bh, w1, b1, w2, vecs


@jax.jit
def transformer_encoder(x, mask, params):
    B, S, H = x.shape
    w_qkv, b_qkv, wo_bh, w1, b1, w2, vecs = _pack_params(params, B)
    vmem_specs = [pl.BlockSpec(memory_space=pltpu.MemorySpace.VMEM) for _ in range(9)]
    return pl.pallas_call(
        encoder_kernel,
        out_shape=jax.ShapeDtypeStruct((B, S, H), x.dtype),
        in_specs=vmem_specs,
        out_specs=pl.BlockSpec(memory_space=pltpu.MemorySpace.VMEM),
    )(x, mask, w_qkv, b_qkv, wo_bh, w1, b1, w2, vecs)


# ------------------------- pure-JAX reference (sanity check) -------------------
def reference(x, mask, params):
    (wq, bq, wk, bk, wv, bv, wo, bo, g1, be1, w1, b1, w2, b2, g2, be2) = params
    B, S, H = x.shape
    q = x @ wq + bq
    k = x @ wk + bk
    v = x @ wv + bv
    q = q.reshape(B, S, HEAD_NUM, HEAD_DIM).transpose(0, 2, 1, 3)
    k = k.reshape(B, S, HEAD_NUM, HEAD_DIM).transpose(0, 2, 1, 3)
    v = v.reshape(B, S, HEAD_NUM, HEAD_DIM).transpose(0, 2, 1, 3)
    scores = jnp.einsum("bhqd,bhkd->bhqk", q, k) / SCALE
    scores = jnp.where(mask[:, None, :, :] == 0, -1e9, scores)
    attn = jax.nn.softmax(scores, axis=-1)
    attn_seq = jnp.einsum("bhqk,bhkd->bhqd", attn, v).transpose(0, 2, 1, 3)
    attn_seq = attn_seq.reshape(B, S, H) @ wo + bo

    def ln(y, g, b):
        mu = jnp.mean(y, axis=-1, keepdims=True)
        var = jnp.mean((y - mu) ** 2, axis=-1, keepdims=True)
        return (y - mu) / jnp.sqrt(var + EPS) * g + b

    connected = x + ln(attn_seq, g1, be1)
    h1 = connected @ w1 + b1
    h1 = 0.5 * h1 * (1.0 + jax.lax.erf(h1 / jnp.sqrt(2.0)))
    ff = h1 @ w2 + b2
    return connected + ln(ff, g2, be2)


def init_params(key):
    ks = jax.random.split(key, 8)

    def lin(k, fan_in, fan_out):
        kw, kb = jax.random.split(k)
        w = jax.random.normal(kw, (fan_in, fan_out), jnp.float32) * 0.02
        b = jax.random.normal(kb, (1, fan_out), jnp.float32) * 0.02
        return w, b

    wq, bq = lin(ks[0], HIDDEN, HIDDEN)
    wk, bk = lin(ks[1], HIDDEN, HIDDEN)
    wv, bv = lin(ks[2], HIDDEN, HIDDEN)
    wo, bo = lin(ks[3], HIDDEN, HIDDEN)
    w1, b1 = lin(ks[4], HIDDEN, FF_DIM)
    w2, b2 = lin(ks[5], FF_DIM, HIDDEN)
    g1 = jnp.ones((1, HIDDEN), jnp.float32)
    be1 = jnp.zeros((1, HIDDEN), jnp.float32)
    g2 = jnp.ones((1, HIDDEN), jnp.float32)
    be2 = jnp.zeros((1, HIDDEN), jnp.float32)
    return (wq, bq, wk, bk, wv, bv, wo, bo, g1, be1, w1, b1, w2, b2, g2, be2)


if __name__ == "__main__":
    key = jax.random.PRNGKey(0)
    kx, kp = jax.random.split(key)

    x = jax.random.normal(kx, (BATCH, SEQ, HIDDEN), jnp.float32)

    # mask: (B, S, S), 0 == masked.  batch 0: full attention; batch 1: last two
    # key positions masked out.
    mask = jnp.ones((BATCH, SEQ, SEQ), jnp.int32)
    mask = mask.at[1, :, SEQ - 2:].set(0)

    params = init_params(kp)

    out = jax.block_until_ready(transformer_encoder(x, mask, params))

    ref = reference(x, mask, params)
    assert out.shape == (BATCH, SEQ, HIDDEN)
    # small extra slack vs f32 exact: softmax denom uses the EUP approx reciprocal
    assert jnp.allclose(out, ref, rtol=2e-3, atol=2e-3), "mismatch vs reference"

    print("KERNEL_OK")
</pallas_src>

<mosaic_0001>
module attributes {stable_mosaic.version = 11 : i64} {
  func.func @encoder_kernel(%arg0: memref<2x8x32xf32, #tpu.memory_space<vmem>>, %arg1: memref<2x8x8xi32, #tpu.memory_space<vmem>>, %arg2: memref<24x32x8xf32, #tpu.memory_space<vmem>>, %arg3: memref<24x1x8xf32, #tpu.memory_space<vmem>>, %arg4: memref<8x8x32xf32, #tpu.memory_space<vmem>>, %arg5: memref<32x128xf32, #tpu.memory_space<vmem>>, %arg6: memref<1x128xf32, #tpu.memory_space<vmem>>, %arg7: memref<128x32xf32, #tpu.memory_space<vmem>>, %arg8: memref<6x32xf32, #tpu.memory_space<vmem>>, %arg9: memref<2x8x32xf32, #tpu.memory_space<vmem>>) attributes {dimension_semantics = [], scalar_prefetch = 0 : i64, scratch_operands = 0 : i64, tpu.core_type = #tpu.core_type<tc>} {
    %c0 = arith.constant 0 : index
    %c0_0 = arith.constant 0 : index
    %c0_1 = arith.constant 0 : index
    %0 = vector.load %arg0[%c0, %c0_0, %c0_1] : memref<2x8x32xf32, #tpu.memory_space<vmem>>, vector<2x8x32xf32>
    %1 = vector.shape_cast %0 : vector<2x8x32xf32> to vector<16x32xf32>
    %2 = vector.shape_cast %0 : vector<2x8x32xf32> to vector<2x1x8x32xf32>
    %3 = vector.shape_cast %2 : vector<2x1x8x32xf32> to vector<2x1x8x32xf32>
    %4 = vector.broadcast %3 : vector<2x1x8x32xf32> to vector<2x4x8x32xf32>
    %5 = vector.shape_cast %4 : vector<2x4x8x32xf32> to vector<8x8x32xf32>
    %c0_2 = arith.constant 0 : index
    %c0_3 = arith.constant 0 : index
    %c0_4 = arith.constant 0 : index
    %6 = vector.load %arg2[%c0_2, %c0_3, %c0_4] : memref<24x32x8xf32, #tpu.memory_space<vmem>>, vector<24x32x8xf32>
    %c0_5 = arith.constant 0 : index
    %c0_6 = arith.constant 0 : index
    %c0_7 = arith.constant 0 : index
    %7 = vector.load %arg3[%c0_5, %c0_6, %c0_7] : memref<24x1x8xf32, #tpu.memory_space<vmem>>, vector<24x1x8xf32>
    %8 = vector.extract_strided_slice %6 {offsets = [0, 0, 0], sizes = [8, 32, 8], strides = [1, 1, 1]} : vector<24x32x8xf32> to vector<8x32x8xf32>
    "tpu.trace_start"() <{level = 10 : i32, message = "bsh,bhd->bsd"}> : () -> ()
    %cst = arith.constant dense<0.000000e+00> : vector<8x8x8xf32>
    %9 = tpu.matmul %5, %8, %cst {dimension_numbers = #tpu.dot_dimension_numbers<[2], [1], [1], [2], [0, 0, 0, 1, 1, 2], [0], [0]>} : vector<8x8x32xf32>, vector<8x32x8xf32>, vector<8x8x8xf32> -> vector<8x8x8xf32>
    "tpu.trace_stop"() : () -> ()
    %10 = vector.extract_strided_slice %7 {offsets = [0, 0, 0], sizes = [8, 1, 8], strides = [1, 1, 1]} : vector<24x1x8xf32> to vector<8x1x8xf32>
    %11 = vector.broadcast %10 : vector<8x1x8xf32> to vector<8x8x8xf32>
    %12 = arith.addf %9, %11 : vector<8x8x8xf32>
    %13 = vector.extract_strided_slice %6 {offsets = [8, 0, 0], sizes = [8, 32, 8], strides = [1, 1, 1]} : vector<24x32x8xf32> to vector<8x32x8xf32>
    "tpu.trace_start"() <{level = 10 : i32, message = "bsh,bhd->bsd"}> : () -> ()
    %cst_8 = arith.constant dense<0.000000e+00> : vector<8x8x8xf32>
    %14 = tpu.matmul %5, %13, %cst_8 {dimension_numbers = #tpu.dot_dimension_numbers<[2], [1], [1], [2], [0, 0, 0, 1, 1, 2], [0], [0]>} : vector<8x8x32xf32>, vector<8x32x8xf32>, vector<8x8x8xf32> -> vector<8x8x8xf32>
    "tpu.trace_stop"() : () -> ()
    %15 = vector.extract_strided_slice %7 {offsets = [8, 0, 0], sizes = [8, 1, 8], strides = [1, 1, 1]} : vector<24x1x8xf32> to vector<8x1x8xf32>
    %16 = vector.broadcast %15 : vector<8x1x8xf32> to vector<8x8x8xf32>
    %17 = arith.addf %14, %16 : vector<8x8x8xf32>
    %18 = vector.extract_strided_slice %6 {offsets = [16, 0, 0], sizes = [8, 32, 8], strides = [1, 1, 1]} : vector<24x32x8xf32> to vector<8x32x8xf32>
    "tpu.trace_start"() <{level = 10 : i32, message = "bsh,bhd->bsd"}> : () -> ()
    %cst_9 = arith.constant dense<0.000000e+00> : vector<8x8x8xf32>
    %19 = tpu.matmul %5, %18, %cst_9 {dimension_numbers = #tpu.dot_dimension_numbers<[2], [1], [1], [2], [0, 0, 0, 1, 1, 2], [0], [0]>} : vector<8x8x32xf32>, vector<8x32x8xf32>, vector<8x8x8xf32> -> vector<8x8x8xf32>
    "tpu.trace_stop"() : () -> ()
    %20 = vector.extract_strided_slice %7 {offsets = [16, 0, 0], sizes = [8, 1, 8], strides = [1, 1, 1]} : vector<24x1x8xf32> to vector<8x1x8xf32>
    %21 = vector.broadcast %20 : vector<8x1x8xf32> to vector<8x8x8xf32>
    %22 = arith.addf %19, %21 : vector<8x8x8xf32>
    %c0_10 = arith.constant 0 : index
    %c0_11 = arith.constant 0 : index
    %c0_12 = arith.constant 0 : index
    %23 = vector.load %arg1[%c0_10, %c0_11, %c0_12] : memref<2x8x8xi32, #tpu.memory_space<vmem>>, vector<2x8x8xi32>
    %c0_i32 = arith.constant 0 : i32
    %24 = vector.broadcast %c0_i32 : i32 to vector<2x8x8xi32>
    %25 = arith.cmpi eq, %23, %24 : vector<2x8x8xi32>
    %cst_13 = arith.constant -1.000000e+09 : f32
    %cst_14 = arith.constant 0.000000e+00 : f32
    %26 = vector.broadcast %cst_13 : f32 to vector<2x8x8xf32>
    %27 = vector.broadcast %cst_14 : f32 to vector<2x8x8xf32>
    %28 = arith.select %25, %26, %27 : vector<2x8x8xi1>, vector<2x8x8xf32>
    %29 = vector.shape_cast %28 : vector<2x8x8xf32> to vector<2x1x8x8xf32>
    %30 = vector.shape_cast %29 : vector<2x1x8x8xf32> to vector<2x1x8x8xf32>
    %31 = vector.broadcast %30 : vector<2x1x8x8xf32> to vector<2x4x8x8xf32>
    %32 = vector.shape_cast %31 : vector<2x4x8x8xf32> to vector<8x8x8xf32>
    "tpu.trace_start"() <{level = 10 : i32, message = "bqd,bkd->bqk"}> : () -> ()
    %cst_15 = arith.constant dense<0.000000e+00> : vector<8x8x8xf32>
    %33 = tpu.matmul %12, %17, %cst_15 {dimension_numbers = #tpu.dot_dimension_numbers<[2], [2], [1], [1], [0, 0, 0, 1, 1, 1], [0], [0]>} : vector<8x8x8xf32>, vector<8x8x8xf32>, vector<8x8x8xf32> -> vector<8x8x8xf32>
    "tpu.trace_stop"() : () -> ()
    %34 = arith.addf %33, %32 : vector<8x8x8xf32>
    %cst_16 = arith.constant dense<0xFF800000> : vector<8x8xf32>
    %35 = vector.multi_reduction <maximumf>, %34, %cst_16 [2] : vector<8x8x8xf32> to vector<8x8xf32>
    %36 = vector.shape_cast %35 : vector<8x8xf32> to vector<8x8x1xf32>
    %37 = vector.broadcast %36 : vector<8x8x1xf32> to vector<8x8x8xf32>
    %38 = arith.subf %34, %37 : vector<8x8x8xf32>
    %39 = math.exp %38 : vector<8x8x8xf32>
    %cst_17 = arith.constant dense<0.000000e+00> : vector<8x8xf32>
    %40 = vector.multi_reduction <add>, %39, %cst_17 [2] : vector<8x8x8xf32> to vector<8x8xf32>
    %41 = vector.shape_cast %40 : vector<8x8xf32> to vector<8x8x1xf32>
    %42 = tpu.reciprocal %41 {approx = true} : vector<8x8x1xf32> -> vector<8x8x1xf32>
    %43 = vector.broadcast %42 : vector<8x8x1xf32> to vector<8x8x8xf32>
    %44 = arith.mulf %39, %43 : vector<8x8x8xf32>
    "tpu.trace_start"() <{level = 10 : i32, message = "bqk,bkd->bqd"}> : () -> ()
    %cst_18 = arith.constant dense<0.000000e+00> : vector<8x8x8xf32>
    %45 = tpu.matmul %44, %22, %cst_18 {dimension_numbers = #tpu.dot_dimension_numbers<[2], [1], [1], [2], [0, 0, 0, 1, 1, 2], [0], [0]>} : vector<8x8x8xf32>, vector<8x8x8xf32>, vector<8x8x8xf32> -> vector<8x8x8xf32>
    "tpu.trace_stop"() : () -> ()
    %c0_19 = arith.constant 0 : index
    %c0_20 = arith.constant 0 : index
    %c0_21 = arith.constant 0 : index
    %46 = vector.load %arg4[%c0_19, %c0_20, %c0_21] : memref<8x8x32xf32, #tpu.memory_space<vmem>>, vector<8x8x32xf32>
    "tpu.trace_start"() <{level = 10 : i32, message = "bqd,bdh->bqh"}> : () -> ()
    %cst_22 = arith.constant dense<0.000000e+00> : vector<8x8x32xf32>
    %47 = tpu.matmul %45, %46, %cst_22 {dimension_numbers = #tpu.dot_dimension_numbers<[2], [1], [1], [2], [0, 0, 0, 1, 1, 2], [0], [0]>} : vector<8x8x8xf32>, vector<8x8x32xf32>, vector<8x8x32xf32> -> vector<8x8x32xf32>
    "tpu.trace_stop"() : () -> ()
    %48 = vector.shape_cast %47 : vector<8x8x32xf32> to vector<2x4x8x32xf32>
    %49 = vector.extract_strided_slice %48 {offsets = [0, 0, 0, 0], sizes = [2, 1, 8, 32], strides = [1, 1, 1, 1]} : vector<2x4x8x32xf32> to vector<2x1x8x32xf32>
    %50 = vector.shape_cast %49 : vector<2x1x8x32xf32> to vector<2x8x32xf32>
    %51 = vector.extract_strided_slice %48 {offsets = [0, 1, 0, 0], sizes = [2, 1, 8, 32], strides = [1, 1, 1, 1]} : vector<2x4x8x32xf32> to vector<2x1x8x32xf32>
    %52 = vector.shape_cast %51 : vector<2x1x8x32xf32> to vector<2x8x32xf32>
    %53 = arith.addf %50, %52 : vector<2x8x32xf32>
    %54 = vector.extract_strided_slice %48 {offsets = [0, 2, 0, 0], sizes = [2, 1, 8, 32], strides = [1, 1, 1, 1]} : vector<2x4x8x32xf32> to vector<2x1x8x32xf32>
    %55 = vector.shape_cast %54 : vector<2x1x8x32xf32> to vector<2x8x32xf32>
    %56 = arith.addf %53, %55 : vector<2x8x32xf32>
    %57 = vector.extract_strided_slice %48 {offsets = [0, 3, 0, 0], sizes = [2, 1, 8, 32], strides = [1, 1, 1, 1]} : vector<2x4x8x32xf32> to vector<2x1x8x32xf32>
    %58 = vector.shape_cast %57 : vector<2x1x8x32xf32> to vector<2x8x32xf32>
    %59 = arith.addf %56, %58 : vector<2x8x32xf32>
    %c0_23 = arith.constant 0 : index
    %c0_24 = arith.constant 0 : index
    %60 = vector.load %arg8[%c0_23, %c0_24] : memref<6x32xf32, #tpu.memory_space<vmem>>, vector<6x32xf32>
    %61 = vector.shape_cast %59 : vector<2x8x32xf32> to vector<16x32xf32>
    %62 = vector.extract_strided_slice %60 {offsets = [0, 0], sizes = [1, 32], strides = [1, 1]} : vector<6x32xf32> to vector<1x32xf32>
    %63 = vector.broadcast %62 : vector<1x32xf32> to vector<16x32xf32>
    %64 = arith.addf %61, %63 : vector<16x32xf32>
    %65 = vector.extract_strided_slice %60 {offsets = [1, 0], sizes = [1, 32], strides = [1, 1]} : vector<6x32xf32> to vector<1x32xf32>
    %66 = vector.extract_strided_slice %60 {offsets = [2, 0], sizes = [1, 32], strides = [1, 1]} : vector<6x32xf32> to vector<1x32xf32>
    %cst_25 = arith.constant dense<0.000000e+00> : vector<16xf32>
    %67 = vector.multi_reduction <add>, %64, %cst_25 [1] : vector<16x32xf32> to vector<16xf32>
    %68 = vector.shape_cast %67 : vector<16xf32> to vector<16x1xf32>
    %cst_26 = arith.constant 3.200000e+01 : f32
    %69 = vector.broadcast %cst_26 : f32 to vector<16x1xf32>
    %70 = arith.divf %68, %69 : vector<16x1xf32>
    %71 = vector.broadcast %70 : vector<16x1xf32> to vector<16x32xf32>
    %72 = arith.subf %64, %71 : vector<16x32xf32>
    %73 = arith.mulf %72, %72 : vector<16x32xf32>
    %cst_27 = arith.constant dense<0.000000e+00> : vector<16xf32>
    %74 = vector.multi_reduction <add>, %73, %cst_27 [1] : vector<16x32xf32> to vector<16xf32>
    %75 = vector.shape_cast %74 : vector<16xf32> to vector<16x1xf32>
    %cst_28 = arith.constant 3.200000e+01 : f32
    %76 = vector.broadcast %cst_28 : f32 to vector<16x1xf32>
    %77 = arith.divf %75, %76 : vector<16x1xf32>
    %78 = vector.broadcast %70 : vector<16x1xf32> to vector<16x32xf32>
    %79 = arith.subf %64, %78 : vector<16x32xf32>
    %cst_29 = arith.constant 9.99999997E-7 : f32
    %80 = vector.broadcast %cst_29 : f32 to vector<16x1xf32>
    %81 = arith.addf %77, %80 : vector<16x1xf32>
    %82 = math.rsqrt %81 : vector<16x1xf32>
    %83 = vector.broadcast %82 : vector<16x1xf32> to vector<16x32xf32>
    %84 = arith.mulf %79, %83 : vector<16x32xf32>
    %85 = vector.broadcast %65 : vector<1x32xf32> to vector<16x32xf32>
    %86 = arith.mulf %84, %85 : vector<16x32xf32>
    %87 = vector.broadcast %66 : vector<1x32xf32> to vector<16x32xf32>
    %88 = arith.addf %86, %87 : vector<16x32xf32>
    %89 = arith.addf %1, %88 : vector<16x32xf32>
    %c0_30 = arith.constant 0 : index
    %c0_31 = arith.constant 0 : index
    %90 = vector.load %arg5[%c0_30, %c0_31] : memref<32x128xf32, #tpu.memory_space<vmem>>, vector<32x128xf32>
    %cst_32 = arith.constant dense<0.000000e+00> : vector<16x128xf32>
    %91 = tpu.matmul %89, %90, %cst_32 {dimension_numbers = #tpu.dot_dimension_numbers<[1], [0], [0], [1], [0, 0, 1, 1], [], []>} : vector<16x32xf32>, vector<32x128xf32>, vector<16x128xf32> -> vector<16x128xf32>
    %c0_33 = arith.constant 0 : index
    %c0_34 = arith.constant 0 : index
    %92 = vector.load %arg6[%c0_33, %c0_34] : memref<1x128xf32, #tpu.memory_space<vmem>>, vector<1x128xf32>
    %93 = vector.broadcast %92 : vector<1x128xf32> to vector<16x128xf32>
    %94 = arith.addf %91, %93 : vector<16x128xf32>
    %cst_35 = arith.constant 5.000000e-01 : f32
    %95 = vector.broadcast %cst_35 : f32 to vector<16x128xf32>
    %96 = arith.mulf %95, %94 : vector<16x128xf32>
    %cst_36 = arith.constant 0.707106769 : f32
    %97 = vector.broadcast %cst_36 : f32 to vector<16x128xf32>
    %98 = arith.mulf %94, %97 : vector<16x128xf32>
    %99 = math.erf %98 : vector<16x128xf32>
    %cst_37 = arith.constant 1.000000e+00 : f32
    %100 = vector.broadcast %cst_37 : f32 to vector<16x128xf32>
    %101 = arith.addf %100, %99 : vector<16x128xf32>
    %102 = arith.mulf %96, %101 : vector<16x128xf32>
    %c0_38 = arith.constant 0 : index
    %c0_39 = arith.constant 0 : index
    %103 = vector.load %arg7[%c0_38, %c0_39] : memref<128x32xf32, #tpu.memory_space<vmem>>, vector<128x32xf32>
    %cst_40 = arith.constant dense<0.000000e+00> : vector<16x32xf32>
    %104 = tpu.matmul %102, %103, %cst_40 {dimension_numbers = #tpu.dot_dimension_numbers<[1], [0], [0], [1], [0, 0, 1, 1], [], []>} : vector<16x128xf32>, vector<128x32xf32>, vector<16x32xf32> -> vector<16x32xf32>
    %105 = vector.extract_strided_slice %60 {offsets = [3, 0], sizes = [1, 32], strides = [1, 1]} : vector<6x32xf32> to vector<1x32xf32>
    %106 = vector.broadcast %105 : vector<1x32xf32> to vector<16x32xf32>
    %107 = arith.addf %104, %106 : vector<16x32xf32>
    %108 = vector.extract_strided_slice %60 {offsets = [4, 0], sizes = [1, 32], strides = [1, 1]} : vector<6x32xf32> to vector<1x32xf32>
    %109 = vector.extract_strided_slice %60 {offsets = [5, 0], sizes = [1, 32], strides = [1, 1]} : vector<6x32xf32> to vector<1x32xf32>
    %cst_41 = arith.constant dense<0.000000e+00> : vector<16xf32>
    %110 = vector.multi_reduction <add>, %107, %cst_41 [1] : vector<16x32xf32> to vector<16xf32>
    %111 = vector.shape_cast %110 : vector<16xf32> to vector<16x1xf32>
    %cst_42 = arith.constant 3.200000e+01 : f32
    %112 = vector.broadcast %cst_42 : f32 to vector<16x1xf32>
    %113 = arith.divf %111, %112 : vector<16x1xf32>
    %114 = vector.broadcast %113 : vector<16x1xf32> to vector<16x32xf32>
    %115 = arith.subf %107, %114 : vector<16x32xf32>
    %116 = arith.mulf %115, %115 : vector<16x32xf32>
    %cst_43 = arith.constant dense<0.000000e+00> : vector<16xf32>
    %117 = vector.multi_reduction <add>, %116, %cst_43 [1] : vector<16x32xf32> to vector<16xf32>
    %118 = vector.shape_cast %117 : vector<16xf32> to vector<16x1xf32>
    %cst_44 = arith.constant 3.200000e+01 : f32
    %119 = vector.broadcast %cst_44 : f32 to vector<16x1xf32>
    %120 = arith.divf %118, %119 : vector<16x1xf32>
    %121 = vector.broadcast %113 : vector<16x1xf32> to vector<16x32xf32>
    %122 = arith.subf %107, %121 : vector<16x32xf32>
    %cst_45 = arith.constant 9.99999997E-7 : f32
    %123 = vector.broadcast %cst_45 : f32 to vector<16x1xf32>
    %124 = arith.addf %120, %123 : vector<16x1xf32>
    %125 = math.rsqrt %124 : vector<16x1xf32>
    %126 = vector.broadcast %125 : vector<16x1xf32> to vector<16x32xf32>
    %127 = arith.mulf %122, %126 : vector<16x32xf32>
    %128 = vector.broadcast %108 : vector<1x32xf32> to vector<16x32xf32>
    %129 = arith.mulf %127, %128 : vector<16x32xf32>
    %130 = vector.broadcast %109 : vector<1x32xf32> to vector<16x32xf32>
    %131 = arith.addf %129, %130 : vector<16x32xf32>
    %132 = arith.addf %89, %131 : vector<16x32xf32>
    %133 = vector.shape_cast %132 : vector<16x32xf32> to vector<2x8x32xf32>
    %c0_46 = arith.constant 0 : index
    %c0_47 = arith.constant 0 : index
    %c0_48 = arith.constant 0 : index
    %134 = vector.load %arg9[%c0_46, %c0_47, %c0_48] : memref<2x8x32xf32, #tpu.memory_space<vmem>>, vector<2x8x32xf32>
    tpu.vector_store %arg9[%c0_46, %c0_47, %c0_48], %133 {strides = array<i32>} : memref<2x8x32xf32, #tpu.memory_space<vmem>>, vector<2x8x32xf32>,
    return
  }
}

</mosaic_0001>

<bundles_post_ra>
// kernel: transformer_encoder.1
= control target key start
LH: loop header
LB: loop body
LE: loop exit
PB: predicated region body
PF: predicated region fallthrough
CT: control target
= control target key end

     0   :  { %v4952_v2 = vmov 0.0   ;;  %vm203_vm0 = vcmask 261120   ;;  %vm4953_vm1 = vmmov 0   ;;  %s5872_s0 = inlined_call_operand.vmem [shape: f32[2,8,32], index: 0, kind: input, shape index: {}]   ;;  %s5873_s1 = inlined_call_operand.vmem [shape: s32[2,8,8], index: 1, kind: input, shape index: {}]   ;;  %s5874_s2 = inlined_call_operand.vmem [shape: f32[24,32,8], index: 2, kind: input, shape index: {}]   ;;  %s5875_s3 = inlined_call_operand.vmem [shape: f32[24,1,8], index: 3, kind: input, shape index: {}]   ;;  %s5876_s4 = inlined_call_operand.vmem [shape: f32[8,8,32], index: 4, kind: input, shape index: {}]   ;;  %s5877_s5 = inlined_call_operand.vmem [shape: f32[32,128], index: 5, kind: input, shape index: {}]   ;;  %s5878_s6 = inlined_call_operand.vmem [shape: f32[1,128], index: 6, kind: input, shape index: {}]   ;;  %s5879_s7 = inlined_call_operand.vmem [shape: f32[128,32], index: 7, kind: input, shape index: {}]   ;;  %s5880_s8 = inlined_call_operand.vmem [shape: f32[6,32], index: 8, kind: input, shape index: {}]   ;;  %s5881_s9 = inlined_call_operand.hbm [shape: f32[2,8,32], index: 9, kind: output, shape index: {}]  }
   0x1   :  { %v38_v0 = vld [vmem:[%s5874_s2 + $0x18] sm:$0xff]  ;;  %4449 = vmatprep.subr.mxu0 %v4952_v2  ;;  %4482 = vmatprep.subr.mxu1 %v4952_v2  ;;  %v37_v3 = vld [vmem:[%s5874_s2 + $0x10] sm:$0xff]  ;;  %v36_v5 = vld [vmem:[%s5874_s2 + $0x8] sm:$0xff] }
   0x2   :  { %v50_v1 = vld [vmem:[%s5874_s2 + $0x78] sm:$0xff]  ;;  %v49_v4 = vld [vmem:[%s5874_s2 + $0x70] sm:$0xff]  ;;  %4450 = vmatpush3.msra.mxu0 %v38_v0  ;;  %v48_v6 = vld [vmem:[%s5874_s2 + $0x68] sm:$0xff]  ;;  %4457 = vmatprep.mubr.msk.f32.mxu0 %vm4953_vm1, %v4952_v2 }
   0x3   :  { %4483 = vmatpush3.msra.mxu1 %v50_v1  ;;  %4451 = vmatprep.subr.mxu0 %v4952_v2  ;;  %v35_v7 = vld [vmem:[%s5874_s2] sm:$0xff]  ;;  %v42_v10 = vld [vmem:[%s5874_s2 + $0x38] sm:$0xff]  ;;  %v41_v12 = vld [vmem:[%s5874_s2 + $0x30] sm:$0xff] }
   0x4   :  { %4484 = vmatprep.subr.mxu1 %v4952_v2  ;;  %4452 = vmatpush3.msra.mxu0 %v37_v3  ;;  %v47_v8 = vld [vmem:[%s5874_s2 + $0x60] sm:$0xff]  ;;  %v58_v11 = vld [vmem:[%s5874_s2 + $0xb8] sm:$0xff]  ;;  %v57_v13 = vld [vmem:[%s5874_s2 + $0xb0] sm:$0xff] }
   0x5   :  { %4485 = vmatpush3.msra.mxu1 %v49_v4  ;;  %4453 = vmatprep.subr.mxu0 %v4952_v2  ;;  %v5040_v9 = vld [vmem:[%s5872_s0] sm:$0xff]  ;;  %v40_v14 = vld [vmem:[%s5874_s2 + $0x28] sm:$0xff]  ;;  %v46_v18 = vld [vmem:[%s5874_s2 + $0x58] sm:$0xff] }
   0x6   :  { %4486 = vmatprep.subr.mxu1 %v4952_v2  ;;  %4454 = vmatpush3.msra.mxu0 %v36_v5  ;;  %v56_v15 = vld [vmem:[%s5874_s2 + $0xa8] sm:$0xff]  ;;  %v39_v16 = vld [vmem:[%s5874_s2 + $0x20] sm:$0xff]  ;;  %v66_v20 = vld [vmem:[%s5874_s2 + $0xf8] sm:$0xff] }
   0x7   :  { %4487 = vmatpush3.msra.mxu1 %v48_v6  ;;  %4455 = vmatprep.subr.mxu0 %v4952_v2  ;;  %v55_v17 = vld [vmem:[%s5874_s2 + $0xa0] sm:$0xff]  ;;  %v5094_v19 = vld [vmem:[%s5872_s0 + $0x8] sm:$0xff]  ;;  %v45_v21 = vld [vmem:[%s5874_s2 + $0x50] sm:$0xff] }
   0x8   :  { %4488 = vmatprep.subr.mxu1 %v4952_v2  ;;  %4456 = vmatpush3.msra.mxu0 %v35_v7  ;;  %v65_v22 = vld [vmem:[%s5874_s2 + $0xf0] sm:$0xff]  ;;  %v44_v23 = vld [vmem:[%s5874_s2 + $0x48] sm:$0xff] }
   0x9   :  { %4489 = vmatpush3.msra.mxu1 %v47_v8  ;;  %4458 = vmatmul.mubr.msk.f32.vlgmr.msra.gmra.mxu0 %vm203_vm0, %v5040_v9 }
   0xa   :  { %4460 = vmatprep.subr.mxu0 %v4952_v2  ;;  %4490 = vmatprep.mubr.msk.f32.mxu1 %vm4953_vm1, %v4952_v2 }
   0xb   :  { %4504 = vmatprep.subr.mxu1 %v4952_v2  ;;  %4461 = vmatpush3.msra.mxu0 %v42_v10 }
   0xc   :  { %4491 = vmatmul.mubr.msk.f32.vlgmr.msra.gmra.mxu1 %vm203_vm0, %v5040_v9  ;;  %4462 = vmatprep.subr.mxu0 %v4952_v2 }
   0xd   :  { %4505 = vmatpush3.msra.mxu1 %v58_v11  ;;  %4463 = vmatpush3.msra.mxu0 %v41_v12 }
   0xe   :  { %4506 = vmatprep.subr.mxu1 %v4952_v2  ;;  %4464 = vmatprep.subr.mxu0 %v4952_v2 }
   0xf   :  { %4507 = vmatpush3.msra.mxu1 %v57_v13  ;;  %4465 = vmatpush3.msra.mxu0 %v40_v14 }
  0x10   :  { %4508 = vmatprep.subr.mxu1 %v4952_v2  ;;  %4466 = vmatprep.subr.mxu0 %v4952_v2 }
  0x11   :  { %4509 = vmatpush3.msra.mxu1 %v56_v15  ;;  %4467 = vmatpush3.msra.mxu0 %v39_v16 }
  0x12   :  { %4510 = vmatprep.subr.mxu1 %v4952_v2  ;;  %4468 = vmatprep.mubr.msk.f32.mxu0 %vm4953_vm1, %v4952_v2 }
  0x13   :  { %4511 = vmatpush3.msra.mxu1 %v55_v17  ;;  %4469 = vmatmul.mubr.msk.f32.vlgmr.msra.gmra.mxu0 %vm203_vm0, %v5040_v9 }
  0x14   :  { %4471 = vmatprep.subr.mxu0 %v4952_v2  ;;  %4512 = vmatprep.mubr.msk.f32.mxu1 %vm4953_vm1, %v4952_v2 }
  0x15   :  { %4526 = vmatprep.subr.mxu1 %v4952_v2  ;;  %4472 = vmatpush3.msra.mxu0 %v46_v18 }
  0x16   :  { %4513 = vmatmul.mubr.msk.f32.vlgmr.msra.gmra.mxu1 %vm203_vm0, %v5094_v19  ;;  %4473 = vmatprep.subr.mxu0 %v4952_v2 }
  0x17   :  { %14 = vsyncpa [#allocation3], 0  ;;  %4527 = vmatpush3.msra.mxu1 %v66_v20  ;;  %4474 = vmatpush3.msra.mxu0 %v45_v21  ;;  %v64_v24 = vld [vmem:[%s5874_s2 + $0xe8] sm:$0xff]  ;;  %v43_v25 = vld [vmem:[%s5874_s2 + $0x40] sm:$0xff]  ;;  %vm1992_vm2 = vcmask 64512  }
  0x18   :  { %4528 = vmatprep.subr.mxu1 %v4952_v2  ;;  %4475 = vmatprep.subr.mxu0 %v4952_v2  ;;  %v63_v26 = vld [vmem:[%s5874_s2 + $0xe0] sm:$0xff]  ;;  %v54_v27 = vld [vmem:[%s5874_s2 + $0x98] sm:$0xff]  ;;  %v53_v29 = vld [vmem:[%s5874_s2 + $0x90] sm:$0xff] }
  0x19   :  { %4529 = vmatpush3.msra.mxu1 %v65_v22  ;;  %4476 = vmatpush3.msra.mxu0 %v44_v23  ;;  %v74_v28 = vld [vmem:[%s5874_s2 + $0x138] sm:$0xff]  ;;  %v73_v30 = vld [vmem:[%s5874_s2 + $0x130] sm:$0xff]  ;;  %v52_v31 = vld [vmem:[%s5874_s2 + $0x88] sm:$0xff] }
  0x1a   :  { %4530 = vmatprep.subr.mxu1 %v4952_v2  ;;  %4477 = vmatprep.subr.mxu0 %v4952_v2  ;;  %v72_v32 = vld [vmem:[%s5874_s2 + $0x128] sm:$0xff]  ;;  %v51_v33 = vld [vmem:[%s5874_s2 + $0x80] sm:$0xff]  ;;  %v62_v35 = vld [vmem:[%s5874_s2 + $0xd8] sm:$0xff] }
  0x1b   :  { %4531 = vmatpush3.msra.mxu1 %v64_v24  ;;  %4478 = vmatpush3.msra.mxu0 %v43_v25  ;;  %v71_v34 = vld [vmem:[%s5874_s2 + $0x120] sm:$0xff]  ;;  %v82_v36 = vld [vmem:[%s5874_s2 + $0x178] sm:$0xff]  ;;  %v61_v37 = vld [vmem:[%s5874_s2 + $0xd0] sm:$0xff] }
  0x1c   :  { %4532 = vmatprep.subr.mxu1 %v4952_v2  ;;  %4479 = vmatprep.mubr.msk.f32.mxu0 %vm4953_vm1, %v4952_v2  ;;  %v81_v38 = vld [vmem:[%s5874_s2 + $0x170] sm:$0xff]  ;;  %v60_v39 = vld [vmem:[%s5874_s2 + $0xc8] sm:$0xff]  ;;  %v59_v41 = vld [vmem:[%s5874_s2 + $0xc0] sm:$0xff] }
  0x1d   :  { %4533 = vmatpush3.msra.mxu1 %v63_v26  ;;  %4480 = vmatmul.mubr.msk.f32.vlgmr.msra.gmra.mxu0 %vm203_vm0, %v5040_v9  ;;  %v80_v40 = vld [vmem:[%s5874_s2 + $0x168] sm:$0xff]  ;;  %v79_v42 = vld [vmem:[%s5874_s2 + $0x160] sm:$0xff]  ;;  %v70_v43 = vld [vmem:[%s5874_s2 + $0x118] sm:$0xff] }
  0x1e   :  { %4493 = vmatprep.subr.mxu0 %v4952_v2  ;;  %4534 = vmatprep.mubr.msk.f32.mxu1 %vm4953_vm1, %v4952_v2  ;;  %v90_v44 = vld [vmem:[%s5874_s2 + $0x1b8] sm:$0xff]  ;;  %v69_v45 = vld [vmem:[%s5874_s2 + $0x110] sm:$0xff]  ;;  %v68_v47 = vld [vmem:[%s5874_s2 + $0x108] sm:$0xff] }
  0x1f   :  { %4548 = vmatprep.subr.mxu1 %v4952_v2  ;;  %4494 = vmatpush3.msra.mxu0 %v54_v27  ;;  %v89_v46 = vld [vmem:[%s5874_s2 + $0x1b0] sm:$0xff]  ;;  %v88_v48 = vld [vmem:[%s5874_s2 + $0x1a8] sm:$0xff]  ;;  %v67_v49 = vld [vmem:[%s5874_s2 + $0x100] sm:$0xff] }
  0x20   :  { %4535 = vmatmul.mubr.msk.f32.vlgmr.msra.gmra.mxu1 %vm203_vm0, %v5094_v19  ;;  %4495 = vmatprep.subr.mxu0 %v4952_v2  ;;  %v87_v50 = vld [vmem:[%s5874_s2 + $0x1a0] sm:$0xff]  ;;  %v78_v51 = vld [vmem:[%s5874_s2 + $0x158] sm:$0xff]  ;;  %v77_v53 = vld [vmem:[%s5874_s2 + $0x150] sm:$0xff] }
  0x21   :  { %4549 = vmatpush3.msra.mxu1 %v74_v28  ;;  %4496 = vmatpush3.msra.mxu0 %v53_v29  ;;  %v98_v52 = vld [vmem:[%s5874_s2 + $0x1f8] sm:$0xff]  ;;  %v97_v54 = vld [vmem:[%s5874_s2 + $0x1f0] sm:$0xff]  ;;  %v76_v55 = vld [vmem:[%s5874_s2 + $0x148] sm:$0xff] }
  0x22   :  { %4550 = vmatprep.subr.mxu1 %v4952_v2  ;;  %4497 = vmatprep.subr.mxu0 %v4952_v2  ;;  %v96_v56 = vld [vmem:[%s5874_s2 + $0x1e8] sm:$0xff]  ;;  %v75_v57 = vld [vmem:[%s5874_s2 + $0x140] sm:$0xff]  ;;  %v86_v59 = vld [vmem:[%s5874_s2 + $0x198] sm:$0xff] }
  0x23   :  { %4551 = vmatpush3.msra.mxu1 %v73_v30  ;;  %4498 = vmatpush3.msra.mxu0 %v52_v31  ;;  %v95_v58 = vld [vmem:[%s5874_s2 + $0x1e0] sm:$0xff]  ;;  %v85_v60 = vld [vmem:[%s5874_s2 + $0x190] sm:$0xff]  ;;  %v84_v61 = vld [vmem:[%s5874_s2 + $0x188] sm:$0xff] }
  0x24   :  { %4552 = vmatprep.subr.mxu1 %v4952_v2  ;;  %4499 = vmatprep.subr.mxu0 %v4952_v2  ;;  %v83_v62 = vld [vmem:[%s5874_s2 + $0x180] sm:$0xff]  ;;  %v106_v63 = vld [vmem:[%s5874_s2 + $0x238] sm:$0xff]  ;;  %v105_v1 = vld [vmem:[%s5874_s2 + $0x230] sm:$0xff] }
  0x25   :  { %4553 = vmatpush3.msra.mxu1 %v72_v32  ;;  %4500 = vmatpush3.msra.mxu0 %v51_v33  ;;  %v94_v0 = vld [vmem:[%s5874_s2 + $0x1d8] sm:$0xff]  ;;  %v93_v3 = vld [vmem:[%s5874_s2 + $0x1d0] sm:$0xff]  ;;  %v104_v4 = vld [vmem:[%s5874_s2 + $0x228] sm:$0xff] }
  0x26   :  { %4554 = vmatprep.subr.mxu1 %v4952_v2  ;;  %4501 = vmatprep.mubr.msk.f32.mxu0 %vm4953_vm1, %v4952_v2  ;;  %v92_v5 = vld [vmem:[%s5874_s2 + $0x1c8] sm:$0xff]  ;;  %v91_v6 = vld [vmem:[%s5874_s2 + $0x1c0] sm:$0xff]  ;;  %v102_v8 = vld [vmem:[%s5874_s2 + $0x218] sm:$0xff] }
  0x27   :  { %4555 = vmatpush3.msra.mxu1 %v71_v34  ;;  %4502 = vmatmul.mubr.msk.f32.vlgmr.msra.gmra.mxu0 %vm203_vm0, %v5094_v19  ;;  %v103_v7 = vld [vmem:[%s5874_s2 + $0x220] sm:$0xff]  ;;  %v114_v10 = vld [vmem:[%s5874_s2 + $0x278] sm:$0xff]  ;;  %v101_v11 = vld [vmem:[%s5874_s2 + $0x210] sm:$0xff] }
  0x28   :  { %4515 = vmatprep.subr.mxu0 %v4952_v2  ;;  %4556 = vmatprep.mubr.msk.f32.mxu1 %vm4953_vm1, %v4952_v2  ;;  %v113_v12 = vld [vmem:[%s5874_s2 + $0x270] sm:$0xff]  ;;  %v100_v13 = vld [vmem:[%s5874_s2 + $0x208] sm:$0xff]  ;;  %v99_v15 = vld [vmem:[%s5874_s2 + $0x200] sm:$0xff] }
  0x29   :  { %4570 = vmatprep.subr.mxu1 %v4952_v2  ;;  %4516 = vmatpush3.msra.mxu0 %v62_v35  ;;  %v112_v14 = vld [vmem:[%s5874_s2 + $0x268] sm:$0xff]  ;;  %v111_v16 = vld [vmem:[%s5874_s2 + $0x260] sm:$0xff]  ;;  %v110_v17 = vld [vmem:[%s5874_s2 + $0x258] sm:$0xff] }
  0x2a   :  { %4557 = vmatmul.mubr.msk.f32.vlgmr.msra.gmra.mxu1 %vm203_vm0, %v5040_v9  ;;  %4517 = vmatprep.subr.mxu0 %v4952_v2  ;;  %v122_v18 = vld [vmem:[%s5874_s2 + $0x2b8] sm:$0xff]  ;;  %v109_v20 = vld [vmem:[%s5874_s2 + $0x250] sm:$0xff]  ;;  %v108_v22 = vld [vmem:[%s5874_s2 + $0x248] sm:$0xff] }
  0x2b   :  { %4571 = vmatpush3.msra.mxu1 %v82_v36  ;;  %4518 = vmatpush3.msra.mxu0 %v61_v37  ;;  %v121_v21 = vld [vmem:[%s5874_s2 + $0x2b0] sm:$0xff]  ;;  %v120_v23 = vld [vmem:[%s5874_s2 + $0x2a8] sm:$0xff]  ;;  %v107_v24 = vld [vmem:[%s5874_s2 + $0x240] sm:$0xff] }
  0x2c   :  { %4572 = vmatprep.subr.mxu1 %v4952_v2  ;;  %4519 = vmatprep.subr.mxu0 %v4952_v2  ;;  %v119_v25 = vld [vmem:[%s5874_s2 + $0x2a0] sm:$0xff]  ;;  %v118_v26 = vld [vmem:[%s5874_s2 + $0x298] sm:$0xff]  ;;  %v117_v28 = vld [vmem:[%s5874_s2 + $0x290] sm:$0xff] }
  0x2d   :  { %4573 = vmatpush3.msra.mxu1 %v81_v38  ;;  %4520 = vmatpush3.msra.mxu0 %v60_v39  ;;  %v130_v27 = vld [vmem:[%s5874_s2 + $0x2f8] sm:$0xff]  ;;  %v129_v29 = vld [vmem:[%s5874_s2 + $0x2f0] sm:$0xff]  ;;  %v128_v30 = vld [vmem:[%s5874_s2 + $0x2e8] sm:$0xff] }
  0x2e   :  { %4574 = vmatprep.subr.mxu1 %v4952_v2  ;;  %4521 = vmatprep.subr.mxu0 %v4952_v2  ;;  %v115_v31 = vld [vmem:[%s5874_s2 + $0x280] sm:$0xff]  ;;  %v126_v33 = vld [vmem:[%s5874_s2 + $0x2d8] sm:$0xff]  ;;  %v125_v34 = vld [vmem:[%s5874_s2 + $0x2d0] sm:$0xff] }
  0x2f   :  { %4575 = vmatpush3.msra.mxu1 %v80_v40  ;;  %4522 = vmatpush3.msra.mxu0 %v59_v41  ;;  %v127_v32 = vld [vmem:[%s5874_s2 + $0x2e0] sm:$0xff]  ;;  %v124_v35 = vld [vmem:[%s5874_s2 + $0x2c8] sm:$0xff] }
  0x30   :  { %4576 = vmatprep.subr.mxu1 %v4952_v2  ;;  %4523 = vmatprep.mubr.msk.f32.mxu0 %vm4953_vm1, %v4952_v2  ;;  %v123_v36 = vld [vmem:[%s5874_s2 + $0x2c0] sm:$0xff] }
  0x31   :  { %4577 = vmatpush3.msra.mxu1 %v79_v42  ;;  %4578 = vmatprep.mubr.msk.f32.mxu1 %vm4953_vm1, %v4952_v2 }
  0x32   :  { %4524 = vmatmul.mubr.msk.f32.vlgmr.msra.gmra.mxu0 %vm203_vm0, %v5094_v19  ;;  %4537 = vmatprep.subr.mxu0 %v4952_v2 }
  0x33   :  { %4579 = vmatmul.mubr.msk.f32.vlgmr.msra.gmra.mxu1 %vm203_vm0, %v5040_v9  ;;  %4592 = vmatprep.subr.mxu1 %v4952_v2 }
  0x34   :  { %4538 = vmatpush3.msra.mxu0 %v70_v43  ;;  %4593 = vmatpush3.msra.mxu1 %v90_v44 }
  0x35   :  { %4539 = vmatprep.subr.mxu0 %v4952_v2  ;;  %4594 = vmatprep.subr.mxu1 %v4952_v2 }
  0x36   :  { %4540 = vmatpush3.msra.mxu0 %v69_v45  ;;  %4595 = vmatpush3.msra.mxu1 %v89_v46 }
  0x37   :  { %4541 = vmatprep.subr.mxu0 %v4952_v2  ;;  %4596 = vmatprep.subr.mxu1 %v4952_v2 }
  0x38   :  { %4542 = vmatpush3.msra.mxu0 %v68_v47  ;;  %4597 = vmatpush3.msra.mxu1 %v88_v48 }
  0x39   :  { %4543 = vmatprep.subr.mxu0 %v4952_v2  ;;  %4598 = vmatprep.subr.mxu1 %v4952_v2 }
  0x3a   :  { %4544 = vmatpush3.msra.mxu0 %v67_v49  ;;  %4545 = vmatprep.mubr.msk.f32.mxu0 %vm4953_vm1, %v4952_v2 }
  0x3b   :  { %4599 = vmatpush3.msra.mxu1 %v87_v50  ;;  %4600 = vmatprep.mubr.msk.f32.mxu1 %vm4953_vm1, %v4952_v2 }
  0x3c   :  { %4546 = vmatmul.mubr.msk.f32.vlgmr.msra.gmra.mxu0 %vm203_vm0, %v5040_v9  ;;  %4559 = vmatprep.subr.mxu0 %v4952_v2 }
  0x3d   :  { %4601 = vmatmul.mubr.msk.f32.vlgmr.msra.gmra.mxu1 %vm203_vm0, %v5094_v19  ;;  %4614 = vmatprep.subr.mxu1 %v4952_v2 }
  0x3e   :  { %4560 = vmatpush3.msra.mxu0 %v78_v51  ;;  %4615 = vmatpush3.msra.mxu1 %v98_v52  ;;  %v4193_v52 = vld [vmem:[%s5875_s3 + $0xb] ss:$0 sm:$0xff] }
  0x3f   :  { %4561 = vmatprep.subr.mxu0 %v4952_v2  ;;  %4616 = vmatprep.subr.mxu1 %v4952_v2 }
  0x40   :  { %4562 = vmatpush3.msra.mxu0 %v77_v53  ;;  %4617 = vmatpush3.msra.mxu1 %v97_v54 }
  0x41   :  { %4563 = vmatprep.subr.mxu0 %v4952_v2  ;;  %4618 = vmatprep.subr.mxu1 %v4952_v2 }
  0x42   :  { %4564 = vmatpush3.msra.mxu0 %v76_v55  ;;  %4619 = vmatpush3.msra.mxu1 %v96_v56  ;;  %v4177_v55 = vld [vmem:[%s5875_s3 + $0x3] ss:$0 sm:$0xff] }
  0x43   :  { %4565 = vmatprep.subr.mxu0 %v4952_v2  ;;  %4620 = vmatprep.subr.mxu1 %v4952_v2 }
  0x44   :  { %4566 = vmatpush3.msra.mxu0 %v75_v57  ;;  %4567 = vmatprep.mubr.msk.f32.mxu0 %vm4953_vm1, %v4952_v2 }
  0x45   :  { %4621 = vmatpush3.msra.mxu1 %v95_v58  ;;  %4622 = vmatprep.mubr.msk.f32.mxu1 %vm4953_vm1, %v4952_v2 }
  0x46   :  { %4568 = vmatmul.mubr.msk.f32.vlgmr.msra.gmra.mxu0 %vm203_vm0, %v5040_v9  ;;  %4581 = vmatprep.subr.mxu0 %v4952_v2 }
  0x47   :  { %4623 = vmatmul.mubr.msk.f32.vlgmr.msra.gmra.mxu1 %vm203_vm0, %v5094_v19  ;;  %4582 = vmatpush3.msra.mxu0 %v86_v59 }
  0x48   :  { %4583 = vmatprep.subr.mxu0 %v4952_v2  ;;  %4589 = vmatprep.mubr.msk.f32.mxu0 %vm4953_vm1, %v4952_v2 }
  0x49   :  { %4584 = vmatpush3.msra.mxu0 %v85_v60  ;;  %4636 = vmatprep.subr.mxu1 %v4952_v2  ;;  %v4190_v60 = vld [vmem:[%s5875_s3 + $0x8] ss:$0 sm:$0xff] }
  0x4a   :  { %4585 = vmatprep.subr.mxu0 %v4952_v2  ;;  %4644 = vmatprep.mubr.msk.f32.mxu1 %vm4953_vm1, %v4952_v2 }
  0x4b   :  { %4586 = vmatpush3.msra.mxu0 %v84_v61  ;;  %4637 = vmatpush3.msra.mxu1 %v106_v63  ;;  %v4195_v61 = vld [vmem:[%s5875_s3 + $0xd] ss:$0 sm:$0xff] }
  0x4c   :  { %4587 = vmatprep.subr.mxu0 %v4952_v2  ;;  %4638 = vmatprep.subr.mxu1 %v4952_v2 }
  0x4d   :  { %4588 = vmatpush3.msra.mxu0 %v83_v62  ;;  %4639 = vmatpush3.msra.mxu1 %v105_v1  ;;  %v4191_v62 = vld [vmem:[%s5875_s3 + $0x9] ss:$0 sm:$0xff] }
  0x4e   :  { %4590 = vmatmul.mubr.msk.f32.vlgmr.msra.gmra.mxu0 %vm203_vm0, %v5094_v19  ;;  %4603 = vmatprep.subr.mxu0 %v4952_v2 }
  0x4f   :  { %4604 = vmatpush3.msra.mxu0 %v94_v0  ;;  %4611 = vmatprep.mubr.msk.f32.mxu0 %vm4953_vm1, %v4952_v2  ;;  %v4174_v0 = vld [vmem:[%s5875_s3] ss:$0 sm:$0xff] }
  0x50   :  { %4605 = vmatprep.subr.mxu0 %v4952_v2  ;;  %4640 = vmatprep.subr.mxu1 %v4952_v2 }
  0x51   :  { %4606 = vmatpush3.msra.mxu0 %v93_v3  ;;  %4641 = vmatpush3.msra.mxu1 %v104_v4  ;;  %v4179_v4 = vld [vmem:[%s5875_s3 + $0x5] ss:$0 sm:$0xff] }
  0x52   :  { %4607 = vmatprep.subr.mxu0 %v4952_v2  ;;  %4642 = vmatprep.subr.mxu1 %v4952_v2 }
  0x53   :  { %4608 = vmatpush3.msra.mxu0 %v92_v5  ;;  %4643 = vmatpush3.msra.mxu1 %v103_v7 }
  0x54   :  { %4609 = vmatprep.subr.mxu0 %v4952_v2  ;;  %4658 = vmatprep.subr.mxu1 %v4952_v2 }
  0x55   :  { %4610 = vmatpush3.msra.mxu0 %v91_v6  ;;  %4645 = vmatmul.mubr.msk.f32.vlgmr.msra.gmra.mxu1 %vm203_vm0, %v5040_v9 }
  0x56   :  { %4612 = vmatmul.mubr.msk.f32.vlgmr.msra.gmra.mxu0 %vm203_vm0, %v5094_v19  ;;  %4625 = vmatprep.subr.mxu0 %v4952_v2 }
  0x57   :  { %4626 = vmatpush3.msra.mxu0 %v102_v8  ;;  %4659 = vmatpush3.msra.mxu1 %v114_v10 }
  0x58   :  { %4627 = vmatprep.subr.mxu0 %v4952_v2  ;;  %4660 = vmatprep.subr.mxu1 %v4952_v2 }
  0x59   :  { %4628 = vmatpush3.msra.mxu0 %v101_v11  ;;  %4661 = vmatpush3.msra.mxu1 %v113_v12  ;;  %v4175_v11 = vld [vmem:[%s5875_s3 + $0x1] ss:$0 sm:$0xff] }
  0x5a   :  { %4629 = vmatprep.subr.mxu0 %v4952_v2  ;;  %4662 = vmatprep.subr.mxu1 %v4952_v2 }
  0x5b   :  { %4630 = vmatpush3.msra.mxu0 %v100_v13  ;;  %4663 = vmatpush3.msra.mxu1 %v112_v14  ;;  %v4192_v14 = vld [vmem:[%s5875_s3 + $0xa] ss:$0 sm:$0xff] }
  0x5c   :  { %4631 = vmatprep.subr.mxu0 %v4952_v2  ;;  %4633 = vmatprep.mubr.msk.f32.mxu0 %vm4953_vm1, %v4952_v2 }
  0x5d   :  { %4664 = vmatprep.subr.mxu1 %v4952_v2  ;;  %4666 = vmatprep.mubr.msk.f32.mxu1 %vm4953_vm1, %v4952_v2 }
  0x5e   :  { %4632 = vmatpush3.msra.mxu0 %v99_v15  ;;  %4665 = vmatpush3.msra.mxu1 %v111_v16  ;;  %v4197_v15 = vld [vmem:[%s5875_s3 + $0xf] ss:$0 sm:$0xff] }
  0x5f   :  { %4647 = vmatprep.subr.mxu0 %v4952_v2  ;;  %4680 = vmatprep.subr.mxu1 %v4952_v2 }
  0x60   :  { %4634 = vmatmul.mubr.msk.f32.vlgmr.msra.gmra.mxu0 %vm203_vm0, %v5040_v9  ;;  %4667 = vmatmul.mubr.msk.f32.vlgmr.msra.gmra.mxu1 %vm203_vm0, %v5040_v9 }
  0x61   :  { %4648 = vmatpush3.msra.mxu0 %v110_v17  ;;  %4681 = vmatpush3.msra.mxu1 %v122_v18  ;;  %v4176_v17 = vld [vmem:[%s5875_s3 + $0x2] ss:$0 sm:$0xff] }
  0x62   :  { %4649 = vmatprep.subr.mxu0 %v4952_v2  ;;  %4682 = vmatprep.subr.mxu1 %v4952_v2 }
  0x63   :  { %4650 = vmatpush3.msra.mxu0 %v109_v20  ;;  %4683 = vmatpush3.msra.mxu1 %v121_v21  ;;  %v4181_v21 = vld [vmem:[%s5875_s3 + $0x7] ss:$0 sm:$0xff] }
  0x64   :  { %4651 = vmatprep.subr.mxu0 %v4952_v2  ;;  %4684 = vmatprep.subr.mxu1 %v4952_v2 }
  0x65   :  { %4652 = vmatpush3.msra.mxu0 %v108_v22  ;;  %4685 = vmatpush3.msra.mxu1 %v120_v23 }
  0x66   :  { %4653 = vmatprep.subr.mxu0 %v4952_v2  ;;  %4686 = vmatprep.subr.mxu1 %v4952_v2 }
  0x67   :  { %4655 = vmatprep.mubr.msk.f32.mxu0 %vm4953_vm1, %v4952_v2  ;;  %4688 = vmatprep.mubr.msk.f32.mxu1 %vm4953_vm1, %v4952_v2 }
  0x68   :  { %4654 = vmatpush3.msra.mxu0 %v107_v24  ;;  %4687 = vmatpush3.msra.mxu1 %v119_v25 }
  0x69   :  { %4669 = vmatprep.subr.mxu0 %v4952_v2  ;;  %4702 = vmatprep.subr.mxu1 %v4952_v2 }
  0x6a   :  { %4656 = vmatmul.mubr.msk.f32.vlgmr.msra.gmra.mxu0 %vm203_vm0, %v5040_v9  ;;  %4689 = vmatmul.mubr.msk.f32.vlgmr.msra.gmra.mxu1 %vm203_vm0, %v5094_v19  ;;  %v116_v9 = vld [vmem:[%s5874_s2 + $0x288] sm:$0xff] }
  0x6b   :  { %4670 = vmatpush3.msra.mxu0 %v118_v26  ;;  %4703 = vmatpush3.msra.mxu1 %v130_v27  ;;  %v4194_v27 = vld [vmem:[%s5875_s3 + $0xc] ss:$0 sm:$0xff] }
  0x6c   :  { %4671 = vmatprep.subr.mxu0 %v4952_v2  ;;  %4704 = vmatprep.subr.mxu1 %v4952_v2 }
  0x6d   :  { %4672 = vmatpush3.msra.mxu0 %v117_v28  ;;  %4705 = vmatpush3.msra.mxu1 %v129_v29  ;;  %v4178_v29 = vld [vmem:[%s5875_s3 + $0x4] ss:$0 sm:$0xff] }
  0x6e   :  { %4673 = vmatprep.subr.mxu0 %v4952_v2  ;;  %4706 = vmatprep.subr.mxu1 %v4952_v2 }
  0x6f   :  { %4674 = vmatpush3.msra.mxu0 %v116_v9  ;;  %4707 = vmatpush3.msra.mxu1 %v128_v30 }
  0x70   :  { %4675 = vmatprep.subr.mxu0 %v4952_v2  ;;  %4708 = vmatprep.subr.mxu1 %v4952_v2 }
  0x71   :  { %4710 = vmatprep.mubr.msk.f32.mxu1 %vm4953_vm1, %v4952_v2  ;;  %4677 = vmatprep.mubr.msk.f32.mxu0 %vm4953_vm1, %v4952_v2 }
  0x72   :  { %4676 = vmatpush3.msra.mxu0 %v115_v31  ;;  %4709 = vmatpush3.msra.mxu1 %v127_v32  ;;  %v4196_v32 = vld [vmem:[%s5875_s3 + $0xe] ss:$0 sm:$0xff] }
  0x73   :  { %4691 = vmatprep.subr.mxu0 %v4952_v2  ;;  %4711 = vmatmul.mubr.msk.f32.vlgmr.msra.gmra.mxu1 %vm203_vm0, %v5094_v19 }
  0x74   :  { %4728 = vmatprep.subr.mxu1 %v4952_v2  ;;  %4678 = vmatmul.mubr.msk.f32.vlgmr.msra.gmra.mxu0 %vm203_vm0, %v5094_v19 }
  0x75   :  { %4692 = vmatpush3.msra.mxu0 %v126_v33  ;;  %4730 = vmatprep.mubr.msk.f32.mxu1 %vm4953_vm1, %v4952_v2 }
  0x76   :  { %4693 = vmatprep.subr.mxu0 %v4952_v2  ;;  %4699 = vmatprep.mubr.msk.f32.mxu0 %vm4953_vm1, %v4952_v2 }
  0x77   :  { %4694 = vmatpush3.msra.mxu0 %v125_v34  ;;  %v4207_v34 = vld [vmem:[%s5875_s3 + $0x11] ss:$0 sm:$0xff] }
  0x78   :  { %4695 = vmatprep.subr.mxu0 %v4952_v2 }
  0x79   :  { %4696 = vmatpush3.msra.mxu0 %v124_v35  ;;  %v4180_v35 = vld [vmem:[%s5875_s3 + $0x6] ss:$0 sm:$0xff] }
  0x7a   :  { %4697 = vmatprep.subr.mxu0 %v4952_v2 }
  0x7b   :  { %4698 = vmatpush3.msra.mxu0 %v123_v36 }
  0x7c   :  { %4700 = vmatmul.mubr.msk.f32.vlgmr.msra.gmra.mxu0 %vm203_vm0, %v5094_v19  ;;  %4713 = vmatprep.subr.mxu0 %v4952_v2 }
  0x7d   :  { %4715 = vmatprep.mubr.msk.f32.mxu0 %vm4953_vm1, %v4952_v2 }
  0xc9   :  { %v273_v37 = vpop.f32.mrf.mxu0 }
  0xca   :  { %v274_v10 = vadd.f32 %v4174_v0, %v273_v37 }
  0xcb   :  { %v4459_v38 = vpop.f32.mrf.mxu0 }
  0xcc   :  { %v483_v39 = vpop.f32.mrf.mxu1 }
  0xcd   :  { %v484_v59 = vadd.f32 %v4177_v55, %v483_v39 }
  0xce   :  { %v4492_v40 = vpop.f32.mrf.mxu1 }
  0xd3   :  { %v343_v41 = vpop.f32.mrf.mxu0 }
  0xd4   :  { %v344_v13 = vadd.f32 %v4175_v11, %v343_v41 }
  0xd5   :  { %v4470_v42 = vpop.f32.mrf.mxu0 }
  0xd6   :  { %v626_v43 = vpop.f32.mrf.mxu1  ;;  %v4206_v42 = vld [vmem:[%s5875_s3 + $0x10] ss:$0 sm:$0xff] }
  0xd7   :  { %v627_v12 = vadd.f32 %v4179_v4, %v626_v43 }
  0xd8   :  { %v4514_v44 = vpop.f32.mrf.mxu1 }
  0xdd   :  { %v413_v45 = vpop.f32.mrf.mxu0 }
  0xde   :  { %v414_v25 = vadd.f32 %v4176_v17, %v413_v45 }
  0xdf   :  { %v4481_v46 = vpop.f32.mrf.mxu0 }
  0xe0   :  { %v766_v47 = vpop.f32.mrf.mxu1 }
  0xe1   :  { %v767_v26 = vadd.f32 %v4181_v21, %v766_v47 }
  0xe2   :  { %v4536_v48 = vpop.f32.mrf.mxu1 }
  0xe7   :  { %v5503_v49 = vpop.f32.mrf.mxu0 }
  0xe8   :  { %v557_v31 = vadd.f32 %v4178_v29, %v5503_v49 }
  0xe9   :  { %v4503_v19 = vpop.f32.mrf.mxu0 }
  0xea   :  { %v954_v50 = vpop.f32.mrf.mxu1 }
  0xeb   :  { %v955_v7 = vadd.f32 %v4191_v62, %v954_v50 }
  0xec   :  { %v4558_v51 = vpop.f32.mrf.mxu1 }
  0xf2   :  { %v5508_v53 = vpop.f32.mrf.mxu0 }
  0xf3   :  { %v1094_v54 = vpop.f32.mrf.mxu1  ;;  %v697_v40 = vadd.f32 %v4180_v35, %v5508_v53 }
  0xf4   :  { %v1095_v56 = vadd.f32 %v4193_v52, %v1094_v54  ;;  %v4525_v57 = vpop.f32.mrf.mxu0 }
  0xf5   :  { %v4580_v58 = vpop.f32.mrf.mxu1 }
  0xf6   :  { %4729 = vmatpush3.xpose.msk.msra.mxu1 %vm1992_vm2, %v1095_v56 }
  0xf7   :  { %4738 = vmatprep.subr.mxu1 %v4952_v2 }
  0xf9   :  { %4731 = vmatmul.mubr.msk.f32.vlgmr.msra.gmra.mxu1 %vm1992_vm2, %v484_v59  ;;  %v1986_v59 = vld [vmem:[%s5873_s1] sm:$0xff] }
  0xfa   :  { %4740 = vmatprep.mubr.msk.f32.mxu1 %vm4953_vm1, %v4952_v2  ;;  %vm1988_vm3 = vcmp.eq.s32.totalorder %v1986_v59, 0 }
  0xfc   :  { %v884_v63 = vpop.f32.mrf.mxu0 }
  0xfd   :  { %v885_v1 = vadd.f32 %v4190_v60, %v884_v63  ;;  %v1234_v3 = vpop.f32.mrf.mxu1  ;;  %v1990_v60 = vsel %vm1988_vm3, -1e+09, %v4952_v2 }
  0xfe   :  { %v1235_v5 = vadd.f32 %v4195_v61, %v1234_v3  ;;  %v4547_v6 = vpop.f32.mrf.mxu0 }
  0xff   :  { %4714 = vmatpush3.xpose.msk.msra.mxu0 %vm1992_vm2, %v885_v1  ;;  %v4602_v8 = vpop.f32.mrf.mxu1 }
 0x100   :  { %4739 = vmatpush3.xpose.msk.msra.mxu1 %vm1992_vm2, %v1235_v5  ;;  %4718 = vmatprep.subr.mxu0 %v4952_v2  ;;  %v1987_v8 = vld [vmem:[%s5873_s1 + $0x8] sm:$0xff] }
 0x101   :  { %4748 = vmatprep.subr.mxu1 %v4952_v2  ;;  %vm1989_vm4 = vcmp.eq.s32.totalorder %v1987_v8, 0 }
 0x102   :  { %4716 = vmatmul.mubr.msk.f32.vlgmr.msra.gmra.mxu0 %vm1992_vm2, %v274_v10  ;;  %v1991_v17 = vsel %vm1989_vm4, -1e+09, %v4952_v2 }
 0x103   :  { %4741 = vmatmul.mubr.msk.f32.vlgmr.msra.gmra.mxu1 %vm1992_vm2, %v627_v12  ;;  %4719 = vmatpush3.xpose.msk.msra.mxu0 %vm1992_vm2, %v955_v7 }
 0x104   :  { %4720 = vmatprep.mubr.msk.f32.mxu0 %vm4953_vm1, %v4952_v2  ;;  %4723 = vmatprep.subr.mxu0 %v4952_v2 }
 0x105   :  { %4750 = vmatprep.mubr.msk.f32.mxu1 %vm4953_vm1, %v4952_v2 }
 0x106   :  { %v1024_v16 = vpop.f32.mrf.mxu0  ;;  %4721 = vmatmul.mubr.msk.f32.vlgmr.msra.gmra.mxu0 %vm1992_vm2, %v344_v13 }
 0x107   :  { %v1025_v18 = vadd.f32 %v4192_v14, %v1024_v16  ;;  %v1374_v20 = vpop.f32.mrf.mxu1  ;;  %4725 = vmatprep.mubr.msk.f32.mxu0 %vm4953_vm1, %v4952_v2 }
 0x108   :  { %v1375_v22 = vadd.f32 %v4197_v15, %v1374_v20  ;;  %v4569_v23 = vpop.f32.mrf.mxu0 }
 0x109   :  { %4724 = vmatpush3.xpose.msk.msra.mxu0 %vm1992_vm2, %v1025_v18  ;;  %v4624_v24 = vpop.f32.mrf.mxu1 }
 0x10a   :  { %4749 = vmatpush3.xpose.msk.msra.mxu1 %vm1992_vm2, %v1375_v22  ;;  %4733 = vmatprep.subr.mxu0 %v4952_v2 }
 0x10b   :  { %4758 = vmatprep.subr.mxu1 %v4952_v2 }
 0x10c   :  { %4726 = vmatmul.mubr.msk.f32.vlgmr.msra.gmra.mxu0 %vm1992_vm2, %v414_v25 }
 0x10d   :  { %4751 = vmatmul.mubr.msk.f32.vlgmr.msra.gmra.mxu1 %vm1992_vm2, %v767_v26  ;;  %4735 = vmatprep.mubr.msk.f32.mxu0 %vm4953_vm1, %v4952_v2 }
 0x10e   :  { %v1164_v28 = vpop.f32.mrf.mxu0  ;;  %4760 = vmatprep.mubr.msk.f32.mxu1 %vm4953_vm1, %v4952_v2 }
 0x10f   :  { %v1165_v9 = vadd.f32 %v4194_v27, %v1164_v28 }
 0x110   :  { %v4591_v30 = vpop.f32.mrf.mxu0 }
 0x111   :  { %4734 = vmatpush3.xpose.msk.msra.mxu0 %vm1992_vm2, %v1165_v9 }
 0x112   :  { %4743 = vmatprep.subr.mxu0 %v4952_v2 }
 0x114   :  { %4736 = vmatmul.mubr.msk.f32.vlgmr.msra.gmra.mxu0 %vm1992_vm2, %v557_v31 }
 0x115   :  { %4745 = vmatprep.mubr.msk.f32.mxu0 %vm4953_vm1, %v4952_v2  ;;  %v1562_v38 = vpop.f32.mrf.mxu1 }
 0x116   :  { %v1304_v33 = vpop.f32.mrf.mxu0  ;;  %v1563_v39 = vadd.f32 %v4207_v34, %v1562_v38 }
 0x117   :  { %v1305_v36 = vadd.f32 %v4196_v32, %v1304_v33  ;;  %v4646_v41 = vpop.f32.mrf.mxu1 }
 0x118   :  { %v4613_v37 = vpop.f32.mrf.mxu0  ;;  %4759 = vmatpush3.msra.mxu1 %v1563_v39 }
 0x119   :  { %4744 = vmatpush3.xpose.msk.msra.mxu0 %vm1992_vm2, %v1305_v36  ;;  %4768 = vmatprep.subr.mxu1 %v4952_v2 }
 0x11a   :  { %4753 = vmatprep.subr.mxu0 %v4952_v2 }
 0x11c   :  { %4746 = vmatmul.mubr.msk.f32.vlgmr.msra.gmra.mxu0 %vm1992_vm2, %v697_v40 }
 0x11d   :  { %4755 = vmatprep.mubr.msk.f32.mxu0 %vm4953_vm1, %v4952_v2 }
 0x120   :  { %v1492_v43 = vpop.f32.mrf.mxu0  ;;  %v5604_v44 = vpop.f32.mrf.mxu1 }
 0x121   :  { %v1493_v45 = vadd.f32 %v4206_v42, %v1492_v43 }
 0x122   :  { %v4635_v46 = vpop.f32.mrf.mxu0  ;;  %v4668_v47 = vpop.f32.mrf.mxu1 }
 0x123   :  { %4754 = vmatpush3.msra.mxu0 %v1493_v45 }
 0x124   :  { %4763 = vmatprep.subr.mxu0 %v4952_v2 }
 0x12a   :  { %v5607_v48 = vpop.f32.mrf.mxu1  ;;  %v5609_v49 = vpop.f32.mrf.mxu0 }
 0x12c   :  { %v4690_v19 = vpop.f32.mrf.mxu1  ;;  %v4657_v50 = vpop.f32.mrf.mxu0 }
 0x133   :  { %v5611_v51 = vpop.f32.mrf.mxu1 }
 0x134   :  { %v5613_v52 = vpop.f32.mrf.mxu0 }
 0x135   :  { %v4712_v53 = vpop.f32.mrf.mxu1 }
 0x136   :  { %v4679_v54 = vpop.f32.mrf.mxu0 }
 0x13c   :  { %v5615_v55 = vpop.f32.mrf.mxu0 }
 0x13e   :  { %v4701_v56 = vpop.f32.mrf.mxu0 }
 0x1b9   :  { %v2293_v57 = vpop.f32.mrf.mxu1 }
 0x1ba   :  { %v2294_v14 = vadd.f32 %v2293_v57, %v1990_v60 }
 0x1bb   :  { %v4732_v58 = vpop.f32.mrf.mxu1 }
 0x1bc   :  { %v2610_v20 = vsel %vm1992_vm2, %v2294_v14, -inf }
 0x1c2   :  { %v2065_v61 = vpop.f32.mrf.mxu0 }
 0x1c3   :  { %v2066_v62 = vadd.f32 %v2065_v61, %v1990_v60  ;;  %v2445_v63 = vpop.f32.mrf.mxu1 }
 0x1c4   :  { %v4717_v0 = vpop.f32.mrf.mxu0  ;;  %v2446_v18 = vadd.f32 %v2445_v63, %v1991_v17 }
 0x1c5   :  { %v4742_v1 = vpop.f32.mrf.mxu1  ;;  %v2601_v3 = vsel %vm1992_vm2, %v2066_v62, -inf }
 0x1c6   :  { %2602 = vmax.xlane.f32.xlu0 %v2601_v3  ;;  %v2141_v4 = vpop.f32.mrf.mxu0  ;;  %v2616_v25 = vsel %vm1992_vm2, %v2446_v18, -inf }
 0x1c7   :  { %v2142_v5 = vadd.f32 %v2141_v4, %v1990_v60 }
 0x1c8   :  { %v4722_v6 = vpop.f32.mrf.mxu0 }
 0x1c9   :  { %v2604_v7 = vsel %vm1992_vm2, %v2142_v5, -inf }
 0x1ca   :  { %2605 = vmax.xlane.f32.xlu0 %v2604_v7 }
 0x1cc   :  { %v2217_v10 = vpop.f32.mrf.mxu0 }
 0x1cd   :  { %v2597_v11 = vpop.f32.mrf.mxu1  ;;  %v2218_v12 = vadd.f32 %v2217_v10, %v1990_v60 }
 0x1ce   :  { %v4727_v13 = vpop.f32.mrf.mxu0  ;;  %v2598_v24 = vadd.f32 %v2597_v11, %v1991_v17 }
 0x1cf   :  { %v4752_v15 = vpop.f32.mrf.mxu1  ;;  %v2607_v16 = vsel %vm1992_vm2, %v2218_v12, -inf }
 0x1d0   :  { %2608 = vmax.xlane.f32.xlu1 %v2607_v16  ;;  %v2622_v27 = vsel %vm1992_vm2, %v2598_v24, -inf }
 0x1d4   :  { %2611 = vmax.xlane.f32.xlu1 %v2610_v20  ;;  %v2369_v21 = vpop.f32.mrf.mxu0 }
 0x1d5   :  { %v2370_v22 = vadd.f32 %v2369_v21, %v1991_v17 }
 0x1d6   :  { %v4737_v23 = vpop.f32.mrf.mxu0 }
 0x1d7   :  { %v2613_v26 = vsel %vm1992_vm2, %v2370_v22, -inf  ;;  %v4209_v23 = vld [vmem:[%s5875_s3 + $0x13] ss:$0 sm:$0xff] }
 0x1d8   :  { %2617 = vmax.xlane.f32.xlu1 %v2616_v25  ;;  %2614 = vmax.xlane.f32.xlu0 %v2613_v26 }
 0x1dc   :  { %2623 = vmax.xlane.f32.xlu1 %v2622_v27  ;;  %v2521_v28 = vpop.f32.mrf.mxu0 }
 0x1dd   :  { %v2522_v29 = vadd.f32 %v2521_v28, %v1991_v17  ;;  %v4208_v17 = vld [vmem:[%s5875_s3 + $0x12] ss:$0 sm:$0xff]  ;;  %v1703_v28 = vadd.f32 %v4209_v23, %v5604_v44 }
 0x1de   :  { %v4747_v9 = vpop.f32.mrf.mxu0 }
 0x1df   :  { %v2619_v30 = vsel %vm1992_vm2, %v2522_v29, -inf }
 0x1e0   :  { %2620 = vmax.xlane.f32.xlu0 %v2619_v30 }
 0x24f   :  { %v2603_v31 = vpop.xlane.xlu0 %2602 }
 0x250   :  { %v2625_v32 = vsub.f32 %v2066_v62, %v2603_v31 }
 0x252   :  { %v2633_v33 = vmul.f32 1.442695, %v2625_v32  ;;  %v4211_v32 = vld [vmem:[%s5875_s3 + $0x15] ss:$0 sm:$0xff] }
 0x253   :  { %v2606_v34 = vpop.xlane.xlu0 %2605 }
 0x254   :  { %4884 = vpow2.f32 %v2633_v33  ;;  %v2626_v35 = vsub.f32 %v2142_v5, %v2606_v34 }
 0x256   :  { %v2635_v36 = vmul.f32 1.442695, %v2626_v35  ;;  %v1843_v35 = vadd.f32 %v4211_v32, %v5607_v48 }
 0x258   :  { %4886 = vpow2.f32 %v2635_v36 }
 0x259   :  { %v2609_v37 = vpop.xlane.xlu1 %2608 }
 0x25a   :  { %v2627_v38 = vsub.f32 %v2218_v12, %v2609_v37  ;;  %v4212_v37 = vld [vmem:[%s5875_s3 + $0x16] ss:$0 sm:$0xff] }
 0x25c   :  { %v2637_v39 = vmul.f32 1.442695, %v2627_v38 }
 0x25d   :  { %v2612_v40 = vpop.xlane.xlu1 %2611 }
 0x25e   :  { %4888 = vpow2.f32 %v2637_v39  ;;  %v2628_v41 = vsub.f32 %v2294_v14, %v2612_v40 }
 0x260   :  { %v2639_v42 = vmul.f32 1.442695, %v2628_v41  ;;  %v1913_v41 = vadd.f32 %v4212_v37, %v5615_v55 }
 0x261   :  { %v4885_v43 = vpop.eup %4884  ;;  %v2618_v45 = vpop.xlane.xlu1 %2617 }
 0x262   :  { %v2615_v46 = vpop.xlane.xlu0 %2614  ;;  %4890 = vpow2.f32 %v2639_v42  ;;  %v2630_v47 = vsub.f32 %v2446_v18, %v2618_v45  ;;  %v2649_v50 = vsel %vm1992_vm2, %v4885_v43, 0.0  ;;  %v3273_v45 = vld [vmem:[%s5876_s4] sm:$0xff] }
 0x263   :  { %v2629_v19 = vsub.f32 %v2370_v22, %v2615_v46  ;;  %2650 = vadd.xlane.f32.xlu0 %v2649_v50  ;;  %v1633_v22 = vadd.f32 %v4208_v17, %v5609_v49  ;;  %v3274_v46 = vld [vmem:[%s5876_s4 + $0x8] sm:$0xff] }
 0x264   :  { %v2643_v53 = vmul.f32 1.442695, %v2630_v47  ;;  %v3275_v47 = vld [vmem:[%s5876_s4 + $0x10] sm:$0xff] }
 0x265   :  { %v2641_v54 = vmul.f32 1.442695, %v2629_v19  ;;  %v4887_v56 = vpop.eup %4886  ;;  %v2624_v57 = vpop.xlane.xlu1 %2623 }
 0x266   :  { %4892 = vpow2.f32 %v2643_v53  ;;  %v2632_v58 = vsub.f32 %v2598_v24, %v2624_v57  ;;  %v2652_v59 = vsel %vm1992_vm2, %v4887_v56, 0.0  ;;  %v3276_v53 = vld [vmem:[%s5876_s4 + $0x18] sm:$0xff]  ;;  %v3277_v57 = vld [vmem:[%s5876_s4 + $0x20] sm:$0xff] }
 0x267   :  { %4894 = vpow2.f32 %v2641_v54  ;;  %2653 = vadd.xlane.f32.xlu1 %v2652_v59 }
 0x268   :  { %v2647_v60 = vmul.f32 1.442695, %v2632_v58 }
 0x269   :  { %v2621_v61 = vpop.xlane.xlu0 %2620 }
 0x26a   :  { %4896 = vpow2.f32 %v2647_v60  ;;  %v2631_v62 = vsub.f32 %v2522_v29, %v2621_v61  ;;  %v4210_v29 = vld [vmem:[%s5875_s3 + $0x14] ss:$0 sm:$0xff]  ;;  %v3278_v60 = vld [vmem:[%s5876_s4 + $0x28] sm:$0xff] }
 0x26b   :  { %v4889_v63 = vpop.eup %4888  ;;  %v1773_v31 = vadd.f32 %v4210_v29, %v5613_v52  ;;  %v4213_v52 = vld [vmem:[%s5875_s3 + $0x17] ss:$0 sm:$0xff] }
 0x26c   :  { %v2645_v0 = vmul.f32 1.442695, %v2631_v62  ;;  %v2655_v1 = vsel %vm1992_vm2, %v4889_v63, 0.0  ;;  %v1983_v39 = vadd.f32 %v4213_v52, %v5611_v51 }
 0x26d   :  { %2656 = vadd.xlane.f32.xlu0 %v2655_v1  ;;  %v3279_v1 = vld [vmem:[%s5876_s4 + $0x30] sm:$0xff] }
 0x26e   :  { %4898 = vpow2.f32 %v2645_v0 }
 0x26f   :  { %v4891_v3 = vpop.eup %4890 }
 0x270   :  { %v2658_v4 = vsel %vm1992_vm2, %v4891_v3, 0.0 }
 0x271   :  { %2659 = vadd.xlane.f32.xlu1 %v2658_v4 }
 0x273   :  { %v5637_v5 = vpop.eup %4892 }
 0x274   :  { %v5639_v6 = vpop.eup %4894  ;;  %v2664_v7 = vsel %vm1992_vm2, %v5637_v5, 0.0 }
 0x275   :  { %2665 = vadd.xlane.f32.xlu1 %v2664_v7  ;;  %v2661_v8 = vsel %vm1992_vm2, %v5639_v6, 0.0 }
 0x276   :  { %2662 = vadd.xlane.f32.xlu0 %v2661_v8 }
 0x277   :  { %v5645_v10 = vpop.eup %4896 }
 0x278   :  { %v2670_v11 = vsel %vm1992_vm2, %v5645_v10, 0.0 }
 0x279   :  { %2671 = vadd.xlane.f32.xlu1 %v2670_v11 }
 0x27b   :  { %v5649_v12 = vpop.eup %4898 }
 0x27c   :  { %v2667_v13 = vsel %vm1992_vm2, %v5649_v12, 0.0 }
 0x27d   :  { %2668 = vadd.xlane.f32.xlu0 %v2667_v13 }
 0x2ec   :  { %v2651_v14 = vpop.xlane.xlu0 %2650 }
 0x2ed   :  { %4900 = vrcp.f32 %v2651_v14 }
 0x2f0   :  { %v2654_v15 = vpop.xlane.xlu1 %2653 }
 0x2f1   :  { %4902 = vrcp.f32 %v2654_v15 }
 0x2f6   :  { %v2657_v16 = vpop.xlane.xlu0 %2656 }
 0x2f7   :  { %4904 = vrcp.f32 %v2657_v16 }
 0x2fa   :  { %v4901_v18 = vpop.eup %4900  ;;  %v2660_v20 = vpop.xlane.xlu1 %2659 }
 0x2fb   :  { %4906 = vrcp.f32 %v2660_v20  ;;  %v2681_v21 = vmul.f32 %v4901_v18, %v4885_v43 }
 0x2fd   :  { %4756 = vmatmul.mubr.msk.f32.vlgmr.msra.gmra.mxu0 %vm1992_vm2, %v2681_v21 }
 0x2fe   :  { %v4903_v24 = vpop.eup %4902  ;;  %v2666_v25 = vpop.xlane.xlu1 %2665  ;;  %4764 = vmatpush3.msra.mxu0 %v1633_v22  ;;  %4765 = vmatprep.mubr.msk.f32.mxu0 %vm4953_vm1, %v4952_v2 }
 0x2ff   :  { %4908 = vrcp.f32 %v2666_v25  ;;  %v2663_v26 = vpop.xlane.xlu0 %2662  ;;  %v2682_v27 = vmul.f32 %v4903_v24, %v4887_v56  ;;  %4773 = vmatprep.subr.mxu0 %v4952_v2 }
 0x300   :  { %4910 = vrcp.f32 %v2663_v26 }
 0x301   :  { %4761 = vmatmul.mubr.msk.f32.vlgmr.msra.gmra.mxu1 %vm1992_vm2, %v2682_v27 }
 0x302   :  { %v2672_v49 = vpop.xlane.xlu1 %2671  ;;  %4769 = vmatpush3.msra.mxu1 %v1703_v28  ;;  %4770 = vmatprep.mubr.msk.f32.mxu1 %vm4953_vm1, %v4952_v2 }
 0x303   :  { %4912 = vrcp.f32 %v2672_v49  ;;  %4778 = vmatprep.subr.mxu1 %v4952_v2 }
 0x304   :  { %v4905_v9 = vpop.eup %4904 }
 0x305   :  { %v2683_v30 = vmul.f32 %v4905_v9, %v4889_v63  ;;  %v3280_v63 = vld [vmem:[%s5876_s4 + $0x38] sm:$0xff] }
 0x306   :  { %v2669_v44 = vpop.xlane.xlu0 %2668 }
 0x307   :  { %4914 = vrcp.f32 %v2669_v44  ;;  %4766 = vmatmul.mubr.msk.f32.vlgmr.msra.gmra.mxu0 %vm1992_vm2, %v2683_v30 }
 0x308   :  { %v4907_v33 = vpop.eup %4906  ;;  %4774 = vmatpush3.msra.mxu0 %v1773_v31  ;;  %4775 = vmatprep.mubr.msk.f32.mxu0 %vm4953_vm1, %v4952_v2 }
 0x309   :  { %v2684_v34 = vmul.f32 %v4907_v33, %v4891_v3  ;;  %4783 = vmatprep.subr.mxu0 %v4952_v2 }
 0x30b   :  { %4771 = vmatmul.mubr.msk.f32.vlgmr.msra.gmra.mxu1 %vm1992_vm2, %v2684_v34 }
 0x30c   :  { %v4909_v36 = vpop.eup %4908  ;;  %4779 = vmatpush3.msra.mxu1 %v1843_v35  ;;  %4780 = vmatprep.mubr.msk.f32.mxu1 %vm4953_vm1, %v4952_v2 }
 0x30d   :  { %v4911_v38 = vpop.eup %4910  ;;  %4788 = vmatprep.subr.mxu1 %v4952_v2  ;;  %v2686_v48 = vmul.f32 %v4909_v36, %v5637_v5 }
 0x30e   :  { %v2685_v40 = vmul.f32 %v4911_v38, %v5639_v6 }
 0x30f   :  { %4781 = vmatmul.mubr.msk.f32.vlgmr.msra.gmra.mxu1 %vm1992_vm2, %v2686_v48 }
 0x310   :  { %v4913_v42 = vpop.eup %4912  ;;  %4776 = vmatmul.mubr.msk.f32.vlgmr.msra.gmra.mxu0 %vm1992_vm2, %v2685_v40  ;;  %4789 = vmatpush3.msra.mxu1 %v1983_v39 }
 0x311   :  { %4784 = vmatpush3.msra.mxu0 %v1913_v41  ;;  %4790 = vmatprep.mubr.msk.f32.mxu1 %vm4953_vm1, %v4952_v2  ;;  %v2688_v43 = vmul.f32 %v4913_v42, %v5645_v10 }
 0x312   :  { %4785 = vmatprep.mubr.msk.f32.mxu0 %vm4953_vm1, %v4952_v2  ;;  %4793 = vmatprep.subr.mxu0 %v4952_v2 }
 0x313   :  { %4791 = vmatmul.mubr.msk.f32.vlgmr.msra.gmra.mxu1 %vm1992_vm2, %v2688_v43  ;;  %4798 = vmatprep.subr.mxu1 %v4952_v2 }
 0x314   :  { %v4915_v51 = vpop.eup %4914  ;;  %4800 = vmatprep.mubr.msk.f32.mxu1 %vm4953_vm1, %v4952_v2  ;;  %4799 = vmatpush3.msra.mxu1 %v3274_v46  ;;  %v3922_v46 = vld [vmem:[%s5877_s5 + $0x18] sm:$0xff] }
 0x315   :  { %v2687_v55 = vmul.f32 %v4915_v51, %v5649_v12  ;;  %4808 = vmatprep.subr.mxu1 %v4952_v2  ;;  %v3872_v12 = vlaneseq }
 0x317   :  { %4786 = vmatmul.mubr.msk.f32.vlgmr.msra.gmra.mxu0 %vm1992_vm2, %v2687_v55  ;;  %v5761_v15 = vshrl.u32 %v3872_v12, 7 }
 0x318   :  { %4795 = vmatprep.mubr.msk.f32.mxu0 %vm4953_vm1, %v4952_v2  ;;  %4794 = vmatpush3.msra.mxu0 %v3273_v45 }
 0x319   :  { %4803 = vmatprep.subr.mxu0 %v4952_v2  ;;  %v3874_v17 = vsub.s32 0, %v5761_v15 }
 0x3bd   :  { %v2758_v19 = vpop.f32.mrf.mxu0 }
 0x3be   :  { %4796 = vmatmul.mubr.msk.f32.vlgmr.msra.gmra.mxu0 %vm1992_vm2, %v2758_v19  ;;  %v3920_v19 = vld [vmem:[%s5877_s5 + $0x8] sm:$0xff] }
 0x3bf   :  { %v4757_v50 = vpop.f32.mrf.mxu0  ;;  %4804 = vmatpush3.msra.mxu0 %v3275_v47  ;;  %4805 = vmatprep.mubr.msk.f32.mxu0 %vm4953_vm1, %v4952_v2  ;;  %v3921_v47 = vld [vmem:[%s5877_s5 + $0x10] sm:$0xff] }
 0x3c0   :  { %4813 = vmatprep.subr.mxu0 %v4952_v2  ;;  %v3919_v50 = vld [vmem:[%s5877_s5] sm:$0xff] }
 0x3c1   :  { %v2831_v54 = vpop.f32.mrf.mxu1 }
 0x3c2   :  { %4801 = vmatmul.mubr.msk.f32.vlgmr.msra.gmra.mxu1 %vm1992_vm2, %v2831_v54  ;;  %v4035_v54 = vld [vmem:[%s5879_s7 + $0x70] sm:$0xff] }
 0x3c3   :  { %v4762_v56 = vpop.f32.mrf.mxu1  ;;  %4809 = vmatpush3.msra.mxu1 %v3276_v53  ;;  %4810 = vmatprep.mubr.msk.f32.mxu1 %vm4953_vm1, %v4952_v2  ;;  %v4036_v53 = vld [vmem:[%s5879_s7 + $0x78] sm:$0xff] }
 0x3c4   :  { %4818 = vmatprep.subr.mxu1 %v4952_v2  ;;  %v4034_v56 = vld [vmem:[%s5879_s7 + $0x68] sm:$0xff] }
 0x3c7   :  { %v2904_v58 = vpop.f32.mrf.mxu0 }
 0x3c8   :  { %4806 = vmatmul.mubr.msk.f32.vlgmr.msra.gmra.mxu0 %vm1992_vm2, %v2904_v58 }
 0x3c9   :  { %v4767_v59 = vpop.f32.mrf.mxu0  ;;  %4814 = vmatpush3.msra.mxu0 %v3277_v57  ;;  %4815 = vmatprep.mubr.msk.f32.mxu0 %vm4953_vm1, %v4952_v2 }
 0x3ca   :  { %4823 = vmatprep.subr.mxu0 %v4952_v2 }
 0x3cb   :  { %v2977_v61 = vpop.f32.mrf.mxu1 }
 0x3cc   :  { %4811 = vmatmul.mubr.msk.f32.vlgmr.msra.gmra.mxu1 %vm1992_vm2, %v2977_v61 }
 0x3cd   :  { %v4772_v62 = vpop.f32.mrf.mxu1  ;;  %4819 = vmatpush3.msra.mxu1 %v3278_v60  ;;  %4820 = vmatprep.mubr.msk.f32.mxu1 %vm4953_vm1, %v4952_v2  ;;  %v3907_v60 = vsub.s32 1, %v5761_v15 }
 0x3ce   :  { %4828 = vmatprep.subr.mxu1 %v4952_v2 }
 0x3cf   :  { %v3123_v0 = vpop.f32.mrf.mxu1 }
 0x3d0   :  { %v3050_v3 = vpop.f32.mrf.mxu0  ;;  %4821 = vmatmul.mubr.msk.f32.vlgmr.msra.gmra.mxu1 %vm1992_vm2, %v3123_v0 }
 0x3d1   :  { %4816 = vmatmul.mubr.msk.f32.vlgmr.msra.gmra.mxu0 %vm1992_vm2, %v3050_v3  ;;  %v4782_v4 = vpop.f32.mrf.mxu1  ;;  %4829 = vmatpush3.msra.mxu1 %v3280_v63  ;;  %v3913_v63 = vsub.s32 2, %v5761_v15 }
 0x3d2   :  { %v4777_v5 = vpop.f32.mrf.mxu0  ;;  %4830 = vmatprep.mubr.msk.f32.mxu1 %vm4953_vm1, %v4952_v2  ;;  %4824 = vmatpush3.msra.mxu0 %v3279_v1 }
 0x3d3   :  { %v3269_v6 = vpop.f32.mrf.mxu1  ;;  %4825 = vmatprep.mubr.msk.f32.mxu0 %vm4953_vm1, %v4952_v2  ;;  %v5767_v2 = vld [vmem:[%s5880_s8] sm:$0x3f]  ;;  %4833 = vmatprep.subr.mxu0 %v3922_v46 }
 0x3d4   :  { %4831 = vmatmul.mubr.msk.f32.vlgmr.msra.gmra.mxu1 %vm1992_vm2, %v3269_v6  ;;  %v3875_v23 = vrot.slane %v5767_v2, %v3874_v17  ;;  %4844 = vmatprep.subr.mxu1 %v4036_v53  ;;  %v3908_v1 = vrot.slane %v5767_v2, %v3907_v60  ;;  %v3914_v5 = vrot.slane %v5767_v2, %v3913_v63 }
 0x3d5   :  { %v4792_v7 = vpop.f32.mrf.mxu1  ;;  %4845 = vmatpush3.msra.mxu1 %v4036_v53 }
 0x3d6   :  { %4846 = vmatprep.subr.mxu1 %v4035_v54 }
 0x3d7   :  { %v3196_v8 = vpop.f32.mrf.mxu0  ;;  %4847 = vmatpush3.msra.mxu1 %v4035_v54 }
 0x3d8   :  { %4826 = vmatmul.mubr.msk.f32.vlgmr.msra.gmra.mxu0 %vm1992_vm2, %v3196_v8  ;;  %4848 = vmatprep.subr.mxu1 %v4034_v56  ;;  %v4928_v8 = vld [vmem:[%s5872_s0] sm:$0xff] }
 0x3d9   :  { %v4787_v10 = vpop.f32.mrf.mxu0  ;;  %4834 = vmatpush3.msra.mxu0 %v3922_v46  ;;  %4849 = vmatpush3.msra.mxu1 %v4034_v56 }
 0x3da   :  { %4835 = vmatprep.subr.mxu0 %v3921_v47 }
 0x3db   :  { %4836 = vmatpush3.msra.mxu0 %v3921_v47 }
 0x3dc   :  { %4837 = vmatprep.subr.mxu0 %v3920_v19 }
 0x3dd   :  { %4838 = vmatpush3.msra.mxu0 %v3920_v19 }
 0x3de   :  { %4839 = vmatprep.subr.mxu0 %v3919_v50 }
 0x3df   :  { %4840 = vmatpush3.msra.mxu0 %v3919_v50 }
 0x47e   :  { %v3350_v11 = vpop.f32.mrf.mxu0 }
 0x480   :  { %v4797_v13 = vpop.f32.mrf.mxu0 }
 0x482   :  { %v3423_v14 = vpop.f32.mrf.mxu1 }
 0x483   :  { %v3865_v20 = vadd.f32 %v3423_v14, %v3350_v11 }
 0x484   :  { %v4802_v16 = vpop.f32.mrf.mxu1 }
 0x485   :  { %v4929_v16 = vld [vmem:[%s5872_s0 + $0x8] sm:$0xff] }
 0x488   :  { %v3496_v18 = vpop.f32.mrf.mxu0 }
 0x489   :  { %v3867_v22 = vadd.f32 %v3865_v20, %v3496_v18  ;;  %v4033_v18 = vld [vmem:[%s5879_s7 + $0x60] sm:$0xff]  ;;  %v4032_v20 = vld [vmem:[%s5879_s7 + $0x58] sm:$0xff] }
 0x48a   :  { %v4807_v21 = vpop.f32.mrf.mxu0  ;;  %4850 = vmatprep.subr.mxu1 %v4033_v18 }
 0x48b   :  { %4851 = vmatpush3.msra.mxu1 %v4033_v18  ;;  %v4031_v21 = vld [vmem:[%s5879_s7 + $0x50] sm:$0xff] }
 0x48c   :  { %v3569_v24 = vpop.f32.mrf.mxu1  ;;  %4852 = vmatprep.subr.mxu1 %v4032_v20 }
 0x48d   :  { %v3869_v25 = vadd.f32 %v3867_v22, %v3569_v24  ;;  %4853 = vmatpush3.msra.mxu1 %v4032_v20  ;;  %v4030_v22 = vld [vmem:[%s5879_s7 + $0x48] sm:$0xff]  ;;  %v4028_v24 = vld [vmem:[%s5879_s7 + $0x38] sm:$0xff] }
 0x48e   :  { %v4812_v26 = vpop.f32.mrf.mxu1  ;;  %4854 = vmatprep.subr.mxu1 %v4031_v21 }
 0x48f   :  { %v3876_v27 = vadd.f32 %v3875_v23, %v3869_v25  ;;  %4855 = vmatpush3.msra.mxu1 %v4031_v21  ;;  %v4027_v25 = vld [vmem:[%s5879_s7 + $0x30] sm:$0xff]  ;;  %v4026_v26 = vld [vmem:[%s5879_s7 + $0x28] sm:$0xff] }
 0x490   :  { %v3715_v28 = vpop.f32.mrf.mxu1  ;;  %4856 = vmatprep.subr.mxu1 %v4030_v22 }
 0x491   :  { %v3642_v49 = vpop.f32.mrf.mxu0  ;;  %v3878_v29 = vsel %vm203_vm0, %v3876_v27, 0.0  ;;  %4857 = vmatpush3.msra.mxu1 %v4030_v22 }
 0x492   :  { %v4822_v9 = vpop.f32.mrf.mxu1  ;;  %3879 = vadd.xlane.f32.xlu0 %v3878_v29  ;;  %v3866_v32 = vadd.f32 %v3715_v28, %v3642_v49  ;;  %v4024_v28 = vld [vmem:[%s5879_s7 + $0x18] sm:$0xff]  ;;  %v4023_v49 = vld [vmem:[%s5879_s7 + $0x10] sm:$0xff]  ;;  %v4022_v29 = vld [vmem:[%s5879_s7 + $0x8] sm:$0xff] }
 0x493   :  { %v4817_v30 = vpop.f32.mrf.mxu0  ;;  %v4021_v9 = vld [vmem:[%s5879_s7] sm:$0xff] }
 0x494   :  { %v3861_v31 = vpop.f32.mrf.mxu1  ;;  %v4254_v30 = vld [vmem:[%s5878_s6] ss:$0 sm:$0xff]  ;;  %s4954_s6 = smov [#allocation2]  }
 0x496   :  { %v4832_v44 = vpop.f32.mrf.mxu1 }
 0x498   :  { %v3788_v33 = vpop.f32.mrf.mxu0 }
 0x499   :  { %v3868_v34 = vadd.f32 %v3866_v32, %v3788_v33 }
 0x49a   :  { %v4827_v35 = vpop.f32.mrf.mxu0 }
 0x49b   :  { %v3870_v52 = vadd.f32 %v3868_v34, %v3861_v31 }
 0x49d   :  { %v3877_v36 = vadd.f32 %v3875_v23, %v3870_v52  ;;  %v4029_v23 = vld [vmem:[%s5879_s7 + $0x40] sm:$0xff] }
 0x49e   :  { %4858 = vmatprep.subr.mxu1 %v4029_v23 }
 0x49f   :  { %v3881_v37 = vsel %vm203_vm0, %v3877_v36, 0.0  ;;  %4859 = vmatpush3.msra.mxu1 %v4029_v23 }
 0x4a0   :  { %3882 = vadd.xlane.f32.xlu1 %v3881_v37  ;;  %4860 = vmatprep.subr.mxu1 %v4028_v24 }
 0x4a1   :  { %4861 = vmatpush3.msra.mxu1 %v4028_v24 }
 0x4a2   :  { %4862 = vmatprep.subr.mxu1 %v4027_v25 }
 0x4a3   :  { %4863 = vmatpush3.msra.mxu1 %v4027_v25 }
 0x4a4   :  { %4864 = vmatprep.subr.mxu1 %v4026_v26 }
 0x4a5   :  { %4865 = vmatpush3.msra.mxu1 %v4026_v26 }
 0x51b   :  { %v3880_v38 = vpop.xlane.xlu0 %3879 }
 0x51c   :  { %v3885_v48 = vmul.f32 0.03125, %v3880_v38 }
 0x51e   :  { %v3887_v39 = vsub.f32 %v3876_v27, %v3885_v48  ;;  %v4025_v27 = vld [vmem:[%s5879_s7 + $0x20] sm:$0xff]  ;;  %s4163_s7 = sshll.u32 %s4954_s6, 4  ;;  %s4164_s7 = int_to_ptr.vmem [resolvable:$true] %s4163_s7 }
 0x51f   :  { %4866 = vmatprep.subr.mxu1 %v4025_v27  ;;  %s4930_s30 = scalar_lea.vmem %s4164_s7, 256  ;;  %p4935_p1 = scmp.lt.s32.totalorder %s4164_s7, %s4164_s7 }
 0x520   :  { %v3889_v40 = vmul.f32 %v3887_v39, %v3887_v39  ;;  %4867 = vmatpush3.msra.mxu1 %v4025_v27  ;;  %p4931_p0 = scmp.ne.s32.totalorder %s4164_s7, %s4930_s30  ;;  %p4936_p2 = scmp.lt.s32.totalorder %s4930_s30, %s4930_s30 }
 0x521   :  { %4868 = vmatprep.subr.mxu1 %v4024_v28 }
 0x522   :  { %v3891_v41 = vsel %vm203_vm0, %v3889_v40, 0.0  ;;  %4869 = vmatpush3.msra.mxu1 %v4024_v28  ;;  %p4937_p3 = por %p4936_p2, %p4935_p1 }
 0x523   :  { %3892 = vadd.xlane.f32.xlu0 %v3891_v41  ;;  %4870 = vmatprep.subr.mxu1 %v4023_v49 }
 0x524   :  { %4871 = vmatpush3.msra.mxu1 %v4023_v49  ;;  %p4938_p4 = pnand %p4937_p3, %p4931_p0 }
 0x525   :  { %4872 = vmatprep.subr.mxu1 %v4022_v29 }
 0x526   :  { %4873 = vmatpush3.msra.mxu1 %v4022_v29 }
 0x527   :  { %4874 = vmatprep.subr.mxu1 %v4021_v9 }
 0x528   :  { %4875 = vmatpush3.msra.mxu1 %v4021_v9 }
 0x529   :  { %v3883_v42 = vpop.xlane.xlu1 %3882 }
 0x52a   :  { %v3886_v43 = vmul.f32 0.03125, %v3883_v42  ;;  %v4039_v42 = vsub.s32 3, %v5761_v15 }
 0x52c   :  { %v3888_v51 = vsub.f32 %v3877_v36, %v3886_v43  ;;  %v4040_v43 = vrot.slane %v5767_v2, %v4039_v42 }
 0x52e   :  { %v3890_v55 = vmul.f32 %v3888_v51, %v3888_v51 }
 0x530   :  { %v3894_v45 = vsel %vm203_vm0, %v3890_v55, 0.0 }
 0x531   :  { %3895 = vadd.xlane.f32.xlu1 %v3894_v45 }
 0x5ac   :  { %v3893_v57 = vpop.xlane.xlu0 %3892 }
 0x5ad   :  { %v3897_v58 = vmul.f32 0.03125, %v3893_v57 }
 0x5af   :  { %v3899_v59 = vadd.f32 1e-06, %v3897_v58 }
 0x5b1   :  { %4916 = vrsqrt.f32 %v3899_v59 }
 0x5ba   :  { %v3896_v61 = vpop.xlane.xlu1 %3895 }
 0x5bb   :  { %v3898_v62 = vmul.f32 0.03125, %v3896_v61 }
 0x5bd   :  { %v3900_v0 = vadd.f32 1e-06, %v3898_v62 }
 0x5be   :  { %v4917_v3 = vpop.eup %4916 }
 0x5bf   :  { %4918 = vrsqrt.f32 %v3900_v0  ;;  %v3903_v4 = vmul.f32 %v4917_v3, %v3887_v39 }
 0x5c1   :  { %v3909_v6 = vmul.f32 %v3908_v1, %v3903_v4 }
 0x5c3   :  { %v3915_v7 = vadd.f32 %v3914_v5, %v3909_v6  ;;  %v4144_v6 = vsub.s32 4, %v5761_v15 }
 0x5c5   :  { %v5802_v10 = vadd.f32 %v4928_v8, %v3915_v7  ;;  %v4150_v7 = vsub.s32 5, %v5761_v15  ;;  %v4145_v8 = vrot.slane %v5767_v2, %v4144_v6 }
 0x5c7   :  { %4841 = vmatprep.mubr.msk.f32.mxu0 %vm203_vm0, %v5802_v10 }
 0x5cc   :  { %v4919_v11 = vpop.eup %4918 }
 0x5cd   :  { %v3904_v12 = vmul.f32 %v4919_v11, %v3888_v51 }
 0x5cf   :  { %v3910_v13 = vmul.f32 %v3908_v1, %v3904_v12 }
 0x5d1   :  { %v3916_v14 = vadd.f32 %v3914_v5, %v3910_v13  ;;  %v4151_v13 = vrot.slane %v5767_v2, %v4150_v7 }
 0x5d3   :  { %v5809_v17 = vadd.f32 %v4929_v16, %v3916_v14 }
 0x5d5   :  { %4842 = vmatmul.mubr.msk.f32.vlgmr.msra.gmra.mxu0 %vm203_vm0, %v5809_v17 }
 0x695   :  { %v4843_v31 = vpop.f32.mrf.mxu0 }
 0x696   :  { %v4008_v44 = vadd.f32 %v4843_v31, %v4254_v30 }
 0x697   :  { %v4002_v32 = vpop.f32.mrf.mxu0 }
 0x698   :  { %v4014_v33 = vmul.f32 0.70710677, %v4008_v44  ;;  %v4003_v34 = vadd.f32 %v4254_v30, %v4002_v32  ;;  %v4012_v39 = vmul.f32 0.5, %v4008_v44 }
 0x69a   :  { %4920 = verf.f32 %v4014_v33  ;;  %v4013_v35 = vmul.f32 0.70710677, %v4003_v34  ;;  %v4011_v38 = vmul.f32 0.5, %v4003_v34 }
 0x69c   :  { %4922 = verf.f32 %v4013_v35 }
 0x6a7   :  { %v4921_v52 = vpop.eup %4920 }
 0x6a8   :  { %v4018_v37 = vadd.f32 1.0, %v4921_v52 }
 0x6a9   :  { %v4923_v36 = vpop.eup %4922 }
 0x6aa   :  { %v4017_v48 = vadd.f32 1.0, %v4923_v36  ;;  %v4020_v41 = vmul.f32 %v4018_v37, %v4012_v39 }
 0x6ac   :  { %v4019_v40 = vmul.f32 %v4017_v48, %v4011_v38 }
 0x6ae   :  { %4876 = vmatprep.mubr.f32.mxu1 %v4019_v40 }
 0x6af   :  { %4877 = vmatmul.mubr.f32.vlgmr.msra.gmra.mxu1 %v4020_v41 }
 0x76f   :  { %v4878_v51 = vpop.f32.mrf.mxu1 }
 0x770   :  { %v4113_v55 = vadd.f32 %v4878_v51, %v4040_v43 }
 0x771   :  { %v4107_v45 = vpop.f32.mrf.mxu1 }
 0x772   :  { %v4108_v46 = vadd.f32 %v4107_v45, %v4040_v43  ;;  %v4119_v47 = vsel %vm203_vm0, %v4113_v55, 0.0 }
 0x773   :  { %4120 = vadd.xlane.f32.xlu1 %v4119_v47 }
 0x774   :  { %v4116_v19 = vsel %vm203_vm0, %v4108_v46, 0.0 }
 0x775   :  { %4117 = vadd.xlane.f32.xlu0 %v4116_v19 }
 0x7fc   :  { %v4121_v50 = vpop.xlane.xlu1 %4120 }
 0x7fd   :  { %v4123_v53 = vmul.f32 0.03125, %v4121_v50 }
 0x7fe   :  { %v4118_v54 = vpop.xlane.xlu0 %4117 }
 0x7ff   :  { %v4125_v56 = vsub.f32 %v4113_v55, %v4123_v53  ;;  %v4122_v57 = vmul.f32 0.03125, %v4118_v54 }
 0x801   :  { %v4124_v58 = vsub.f32 %v4108_v46, %v4122_v57  ;;  %v4127_v59 = vmul.f32 %v4125_v56, %v4125_v56 }
 0x803   :  { %v4131_v60 = vsel %vm203_vm0, %v4127_v59, 0.0  ;;  %v4126_v61 = vmul.f32 %v4124_v58, %v4124_v58 }
 0x804   :  { %4132 = vadd.xlane.f32.xlu1 %v4131_v60 }
 0x805   :  { %v4128_v62 = vsel %vm203_vm0, %v4126_v61, 0.0 }
 0x806   :  { %4129 = vadd.xlane.f32.xlu0 %v4128_v62 }
 0x88d   :  { %v4133_v63 = vpop.xlane.xlu1 %4132 }
 0x88e   :  { %v4135_v0 = vmul.f32 0.03125, %v4133_v63 }
 0x88f   :  { %v4130_v1 = vpop.xlane.xlu0 %4129 }
 0x890   :  { %v4137_v3 = vadd.f32 1e-06, %v4135_v0  ;;  %v4134_v4 = vmul.f32 0.03125, %v4130_v1 }
 0x892   :  { %4924 = vrsqrt.f32 %v4137_v3  ;;  %v4136_v5 = vadd.f32 1e-06, %v4134_v4 }
 0x894   :  { %4926 = vrsqrt.f32 %v4136_v5 }
 0x89f   :  { %v4925_v11 = vpop.eup %4924 }
 0x8a0   :  { %v4141_v12 = vmul.f32 %v4925_v11, %v4125_v56 }
 0x8a1   :  { %v4927_v14 = vpop.eup %4926 }
 0x8a2   :  { %v4140_v16 = vmul.f32 %v4927_v14, %v4124_v58  ;;  %v4147_v18 = vmul.f32 %v4145_v8, %v4141_v12 }
 0x8a4   :  { %v4146_v20 = vmul.f32 %v4145_v8, %v4140_v16  ;;  %v4153_v21 = vadd.f32 %v4151_v13, %v4147_v18 }
 0x8a6   :  { %v4152_v22 = vadd.f32 %v4151_v13, %v4146_v20  ;;  %v4155_v23 = vadd.f32 %v4153_v21, %v5809_v17 }
 0x8a8   :  { %v4154_v24 = vadd.f32 %v4152_v22, %v5802_v10  ;;  %4157 = vst.msk [vmem:[#allocation2 + $0x8] sm:$0xff] %vm203_vm0, %v4155_v23 }
 0x8aa   :  { %4156 = vst.msk [vmem:[#allocation2] sm:$0xff] %vm203_vm0, %v4154_v24 }
 0x8ab   :  { %4941 = shalt.err (!%p4938_p4)
}
 0x8ac   :  { %s4955_s10 = smov 128   ;;  %s4956_s11 = smov 8  }
 0x8ad   :  { %4169 = dma.vmem_to_hbm [thread:$0]  %s4164_s7, 256, %s5881_s9, [#allocation3], %s4955_s10, %s4955_s10, %s4956_s11  }
 0x8ae   :  { %4950 = dma.done.wait [#allocation3], 256  }
 0x8af   :  { %4951 = vsyncadd [#allocation3], 4294967040 }
 0x8b0   :  { %4173 = vsyncpa [#allocation3], 1 }

</bundles_post_ra>
